<compile_context>
chip_gen: v7x
topology: tpu7x:2x2x1
jax: 0.10.0
libtpu: 0.0.40
codegen_flags: <defaults>
</compile_context>

<pallas_src>
import numpy as np
import jax
import jax.numpy as jnp
from jax.experimental import pallas as pl
from jax.experimental.pallas import tpu as pltpu

# ---------------- configuration (small synthetic shapes) ----------------
B = 2            # batch
NO = 16          # num_obj   (v sequence length)
NQ = 8           # max_len   (q sequence length)
D = 128          # v_size = q_size = output_size (residual requires equality)
NH = 4           # num_head
DH = D // NH     # per-head feature size
SCALE = 1.0 / float(np.sqrt(DH))

# packed weight-slab column layout (every offset is a multiple of 128 lanes)
_GATE_OFF = 0          # [D, 2D] : wg_v4q | wg_q4v
_KQV_OFF = 2 * D       # [D, 6D] : wv(3D) | wq(3D)   (query columns pre-scaled)
_OUT_OFF = 8 * D       # [D, 2D] : wvo | wqo
_SLAB_W = 10 * D


# ----------------------------- kernel math -------------------------------
def _mm(x, w):
    """MXU matmul: bf16 operands, f32 accumulation (w is stored bf16)."""
    return jnp.dot(x.astype(jnp.bfloat16), w, preferred_element_type=jnp.float32)


def _mhsa(key, qry, val):
    """key/qry/val: [N, D] -> [N, D]. Per-head softmax attention.
    The 1/sqrt(DH) scale is already folded into the query projection."""
    outs = []
    for h in range(NH):                                   # NH=4, statically unrolled
        s = slice(h * DH, (h + 1) * DH)
        # contract the feature dim of both (no explicit transpose op)
        logits = jax.lax.dot_general(qry[:, s], key[:, s],
                                     (((1,), (1,)), ((), ())),
                                     preferred_element_type=jnp.float32)
        m = jnp.max(logits, axis=-1, keepdims=True)
        e = jnp.exp(logits - m)
        attn = e * pl.reciprocal(jnp.sum(e, axis=-1, keepdims=True), approx=True)
        outs.append(jnp.dot(attn, val[:, s], preferred_element_type=jnp.float32))
    return jnp.concatenate(outs, axis=-1)


def dyintra_kernel(v_ref, q_ref, w_ref, b_ref, out_v_ref, out_q_ref):
    v = v_ref[0]                                           # [NO, D] f32
    q = q_ref[0]                                           # [NQ, D] f32

    w_gate = w_ref[:, _GATE_OFF:_GATE_OFF + 2 * D]         # bf16 slices (lane-aligned)
    w_kqv = w_ref[:, _KQV_OFF:_KQV_OFF + 6 * D]
    w_out = w_ref[:, _OUT_OFF:_OUT_OFF + 2 * D]
    b_gate = b_ref[:, _GATE_OFF:_GATE_OFF + 2 * D]         # f32
    b_kqv = b_ref[:, _KQV_OFF:_KQV_OFF + 6 * D]
    b_out = b_ref[:, _OUT_OFF:_OUT_OFF + 2 * D]

    # ---- crossed conditioning gates: ONE fused [2,D]@[D,2D] matmul ----
    v_mean = jnp.sum(v, axis=0, keepdims=True) * (1.0 / NO)          # [1, D]
    q_mean = jnp.sum(q, axis=0, keepdims=True) * (1.0 / NQ)          # [1, D]
    means = jnp.concatenate([v_mean, q_mean], axis=0)                # [2, D]
    gates = jax.nn.sigmoid(_mm(means, w_gate) + b_gate)              # [2, 2D]
    gate_q = 1.0 + gates[0:1, 0:D]          # 1 + sigmoid(v4q_gate_lin(v_mean)) gates q
    gate_v = 1.0 + gates[1:2, D:2 * D]      # 1 + sigmoid(q4v_gate_lin(q_mean)) gates v

    # ---- key/query/value projections (ReLU FCNet): ONE fused matmul ----
    x = jnp.concatenate([v, q], axis=0)                              # [NO+NQ, D]
    proj = jnp.maximum(_mm(x, w_kqv) + b_kqv, 0.0)                   # [NO+NQ, 6D]
    v_tran = proj[0:NO, 0:3 * D]                                     # [NO, 3D]
    q_tran = proj[NO:NO + NQ, 3 * D:6 * D]                           # [NQ, 3D]

    # gate key / query / value with a single multiply per modality
    v_g = v_tran * jnp.concatenate([gate_v, gate_v, gate_v], axis=1)
    q_g = q_tran * jnp.concatenate([gate_q, gate_q, gate_q], axis=1)

    v_update = _mhsa(v_g[:, 0:D], v_g[:, D:2 * D], v_g[:, 2 * D:3 * D])
    q_update = _mhsa(q_g[:, 0:D], q_g[:, D:2 * D], q_g[:, 2 * D:3 * D])

    # ---- residual + output FCNet (ReLU): ONE fused matmul ----
    y = jnp.concatenate([v + v_update, q + q_update], axis=0)        # [NO+NQ, D]
    out = jnp.maximum(_mm(y, w_out) + b_out, 0.0)                    # [NO+NQ, 2D]
    out_v_ref[0] = out[0:NO, 0:D]
    out_q_ref[0] = out[NO:NO + NQ, D:2 * D]


# ------------------------------ wrapper ----------------------------------
def dy_intra_modality_update(v, q, w_slab, b_slab):
    """v: [B, NO, D], q: [B, NQ, D] -> (updated_v [B, NO, D], updated_q [B, NQ, D])."""
    flops = B * (2 * 2 * D * 2 * D                 # gates
                 + 2 * (NO + NQ) * D * 6 * D       # k/q/v projections
                 + NH * 4 * (NO * NO + NQ * NQ) * DH   # attention (logits + AV)
                 + 2 * (NO + NQ) * D * 2 * D)      # output projections
    transc = B * (2 * D + NH * (NO * NO + NQ * NQ) + NH * (NO + NQ))
    bytes_acc = (2 * B * (NO + NQ) * D * 4         # v,q in + outputs
                 + D * _SLAB_W * 2                  # bf16 weight slab
                 + _SLAB_W * 4)                     # f32 bias slab
    return pl.pallas_call(
        dyintra_kernel,
        out_shape=(jax.ShapeDtypeStruct((B, NO, D), jnp.float32),
                   jax.ShapeDtypeStruct((B, NQ, D), jnp.float32)),
        grid=(B,),
        in_specs=[
            pl.BlockSpec((1, NO, D), lambda b: (b, 0, 0)),
            pl.BlockSpec((1, NQ, D), lambda b: (b, 0, 0)),
            pl.BlockSpec((D, _SLAB_W), lambda b: (0, 0)),    # weights: constant block
            pl.BlockSpec((1, _SLAB_W), lambda b: (0, 0)),    # biases:  constant block
        ],
        out_specs=(
            pl.BlockSpec((1, NO, D), lambda b: (b, 0, 0)),
            pl.BlockSpec((1, NQ, D), lambda b: (b, 0, 0)),
        ),
        compiler_params=pltpu.CompilerParams(dimension_semantics=("parallel",)),
        cost_estimate=pl.CostEstimate(flops=int(flops), transcendentals=int(transc),
                                      bytes_accessed=int(bytes_acc)),
    )(v, q, w_slab, b_slab)


def init_params(key):
    """PyTorch-Linear-style uniform init; weights stored pre-transposed [in, out]."""
    ks = jax.random.split(key, 12)

    def lin(kw, kb, fan_in, fan_out):
        bound = 1.0 / float(np.sqrt(fan_in))
        w = jax.random.uniform(kw, (fan_in, fan_out), jnp.float32, -bound, bound)
        b = jax.random.uniform(kb, (1, fan_out), jnp.float32, -bound, bound)
        return w, b

    wg_v4q, bg_v4q = lin(ks[0], ks[1], D, D)        # v4q_gate_lin
    wg_q4v, bg_q4v = lin(ks[2], ks[3], D, D)        # q4v_gate_lin
    wv, bv = lin(ks[4], ks[5], D, 3 * D)            # v_lin (relu)
    wq, bq = lin(ks[6], ks[7], D, 3 * D)            # q_lin (relu)
    wvo, bvo = lin(ks[8], ks[9], D, D)              # v_output (relu)
    wqo, bqo = lin(ks[10], ks[11], D, D)            # q_output (relu)
    return (wg_v4q, bg_v4q, wg_q4v, bg_q4v, wv, bv, wq, bq, wvo, bvo, wqo, bqo)


def pack_params(params):
    """Pack the 12 tensors into one bf16 weight slab and one f32 bias slab.
    1/sqrt(DH) is folded into the query-block columns (valid through ReLU)."""
    (wg_v4q, bg_v4q, wg_q4v, bg_q4v, wv, bv, wq, bq, wvo, bvo, wqo, bqo) = params

    def fold(w, b):   # scale the query third of the k/q/v projection
        return (w.at[:, D:2 * D].multiply(SCALE), b.at[:, D:2 * D].multiply(SCALE))

    wv_f, bv_f = fold(wv, bv)
    wq_f, bq_f = fold(wq, bq)
    w_slab = jnp.concatenate([wg_v4q, wg_q4v, wv_f, wq_f, wvo, wqo],
                             axis=1).astype(jnp.bfloat16)            # [D, 10D]
    b_slab = jnp.concatenate([bg_v4q, bg_q4v, bv_f, bq_f, bvo, bqo],
                             axis=1).astype(jnp.float32)             # [1, 10D]
    return w_slab, b_slab


# -------------------------- pure-JAX reference ---------------------------
def reference(v, q, params):
    (wg_v4q, bg_v4q, wg_q4v, bg_q4v, wv, bv, wq, bq, wvo, bvo, wqo, bqo) = params
    v_mean = jnp.sum(v, axis=1) / NO
    q_mean = jnp.sum(q, axis=1) / NQ
    v4q_gate = jax.nn.sigmoid(v_mean @ wg_v4q + bg_v4q)[:, None, :]
    q4v_gate = jax.nn.sigmoid(q_mean @ wg_q4v + bg_q4v)[:, None, :]
    v_tran = jax.nn.relu(jnp.einsum('bnd,de->bne', v, wv) + bv)
    q_tran = jax.nn.relu(jnp.einsum('bnd,de->bne', q, wq) + bq)
    v_key, v_qry, v_val = jnp.split(v_tran, 3, axis=2)
    q_key, q_qry, q_val = jnp.split(q_tran, 3, axis=2)
    gv = 1.0 + q4v_gate
    gq = 1.0 + v4q_gate

    def mhsa(k, qr, vl):
        outs = []
        for h in range(NH):
            s = slice(h * DH, (h + 1) * DH)
            logits = jnp.einsum('bqd,bkd->bqk', qr[..., s], k[..., s]) / np.sqrt(DH)
            a = jax.nn.softmax(logits, axis=-1)
            outs.append(jnp.einsum('bqk,bkd->bqd', a, vl[..., s]))
        return jnp.concatenate(outs, axis=-1)

    v_update = mhsa(gv * v_key, gv * v_qry, gv * v_val)
    q_update = mhsa(gq * q_key, gq * q_qry, gq * q_val)
    upd_v = jax.nn.relu(jnp.einsum('bnd,de->bne', v + v_update, wvo) + bvo)
    upd_q = jax.nn.relu(jnp.einsum('bnd,de->bne', q + q_update, wqo) + bqo)
    return upd_v, upd_q


# --------------------------------- main -----------------------------------
if __name__ == "__main__":
    key = jax.random.PRNGKey(0)
    k_params, k_v, k_q = jax.random.split(key, 3)
    params = init_params(k_params)
    w_slab, b_slab = pack_params(params)
    v = jax.random.normal(k_v, (B, NO, D), jnp.float32)
    q = jax.random.normal(k_q, (B, NQ, D), jnp.float32)

    out_v, out_q = jax.block_until_ready(dy_intra_modality_update(v, q, w_slab, b_slab))
    assert out_v.shape == (B, NO, D), out_v.shape
    assert out_q.shape == (B, NQ, D), out_q.shape

    ref_v, ref_q = jax.block_until_ready(reference(v, q, params))
    np.testing.assert_allclose(np.asarray(out_v), np.asarray(ref_v), rtol=2e-2, atol=2e-2)
    np.testing.assert_allclose(np.asarray(out_q), np.asarray(ref_q), rtol=2e-2, atol=2e-2)

    print("KERNEL_OK")
</pallas_src>

<mosaic_0001>
module attributes {stable_mosaic.version = 11 : i64} {
  func.func @dyintra_kernel(%arg0: i32, %arg1: memref<1x16x128xf32, #tpu.memory_space<vmem>>, %arg2: memref<1x8x128xf32, #tpu.memory_space<vmem>>, %arg3: memref<128x1280xbf16, #tpu.memory_space<vmem>>, %arg4: memref<1x1280xf32, #tpu.memory_space<vmem>>, %arg5: memref<1x16x128xf32, #tpu.memory_space<vmem>>, %arg6: memref<1x8x128xf32, #tpu.memory_space<vmem>>) attributes {dimension_semantics = [#tpu.dimension_semantics<parallel>], iteration_bounds = array<i64: 2>, scalar_prefetch = 0 : i64, scratch_operands = 0 : i64, tpu.core_type = #tpu.core_type<tc>, window_params = [{transform_indices = @transform_0, window_bounds = array<i64: 1, 16, 128>}, {transform_indices = @transform_1, window_bounds = array<i64: 1, 8, 128>}, {pipeline_mode = #tpu.pipeline_mode<synchronous>, transform_indices = @transform_2, window_bounds = array<i64: 128, 1280>}, {pipeline_mode = #tpu.pipeline_mode<synchronous>, transform_indices = @transform_3, window_bounds = array<i64: 1, 1280>}, {transform_indices = @transform_4, window_bounds = array<i64: 1, 16, 128>}, {transform_indices = @transform_5, window_bounds = array<i64: 1, 8, 128>}]} {
    %c0 = arith.constant 0 : index
    %c0_0 = arith.constant 0 : index
    %c0_1 = arith.constant 0 : index
    %0 = vector.load %arg1[%c0, %c0_0, %c0_1] : memref<1x16x128xf32, #tpu.memory_space<vmem>>, vector<1x16x128xf32>
    %1 = vector.shape_cast %0 : vector<1x16x128xf32> to vector<16x128xf32>
    %c0_2 = arith.constant 0 : index
    %c0_3 = arith.constant 0 : index
    %c0_4 = arith.constant 0 : index
    %2 = vector.load %arg2[%c0_2, %c0_3, %c0_4] : memref<1x8x128xf32, #tpu.memory_space<vmem>>, vector<1x8x128xf32>
    %3 = vector.shape_cast %2 : vector<1x8x128xf32> to vector<8x128xf32>
    %c0_5 = arith.constant 0 : index
    %c0_6 = arith.constant 0 : index
    %4 = vector.load %arg3[%c0_5, %c0_6] : memref<128x1280xbf16, #tpu.memory_space<vmem>>, vector<128x256xbf16>
    %c0_7 = arith.constant 0 : index
    %c256 = arith.constant 256 : index
    %5 = vector.load %arg3[%c0_7, %c256] : memref<128x1280xbf16, #tpu.memory_space<vmem>>, vector<128x768xbf16>
    %c0_8 = arith.constant 0 : index
    %c1024 = arith.constant 1024 : index
    %6 = vector.load %arg3[%c0_8, %c1024] : memref<128x1280xbf16, #tpu.memory_space<vmem>>, vector<128x256xbf16>
    %c0_9 = arith.constant 0 : index
    %c0_10 = arith.constant 0 : index
    %7 = vector.load %arg4[%c0_9, %c0_10] : memref<1x1280xf32, #tpu.memory_space<vmem>>, vector<1x256xf32>
    %c0_11 = arith.constant 0 : index
    %c256_12 = arith.constant 256 : index
    %8 = vector.load %arg4[%c0_11, %c256_12] : memref<1x1280xf32, #tpu.memory_space<vmem>>, vector<1x768xf32>
    %c0_13 = arith.constant 0 : index
    %c1024_14 = arith.constant 1024 : index
    %9 = vector.load %arg4[%c0_13, %c1024_14] : memref<1x1280xf32, #tpu.memory_space<vmem>>, vector<1x256xf32>
    %cst = arith.constant dense<0.000000e+00> : vector<128xf32>
    %10 = vector.multi_reduction <add>, %1, %cst [0] : vector<16x128xf32> to vector<128xf32>
    %11 = vector.shape_cast %10 : vector<128xf32> to vector<1x128xf32>
    %cst_15 = arith.constant 6.250000e-02 : f32
    %12 = vector.broadcast %cst_15 : f32 to vector<1x128xf32>
    %13 = arith.mulf %11, %12 : vector<1x128xf32>
    %cst_16 = arith.constant dense<0.000000e+00> : vector<128xf32>
    %14 = vector.multi_reduction <add>, %3, %cst_16 [0] : vector<8x128xf32> to vector<128xf32>
    %15 = vector.shape_cast %14 : vector<128xf32> to vector<1x128xf32>
    %cst_17 = arith.constant 1.250000e-01 : f32
    %16 = vector.broadcast %cst_17 : f32 to vector<1x128xf32>
    %17 = arith.mulf %15, %16 : vector<1x128xf32>
    %18 = tpu.concatenate %13, %17 in 0 : vector<1x128xf32>, vector<1x128xf32> -> vector<2x128xf32>
    %19 = arith.truncf %18 : vector<2x128xf32> to vector<2x128xbf16>
    %cst_18 = arith.constant dense<0.000000e+00> : vector<2x256xf32>
    %20 = tpu.matmul %19, %4, %cst_18 {dimension_numbers = #tpu.dot_dimension_numbers<[1], [0], [0], [1], [0, 0, 1, 1], [], []>} : vector<2x128xbf16>, vector<128x256xbf16>, vector<2x256xf32> -> vector<2x256xf32>
    %21 = vector.broadcast %7 : vector<1x256xf32> to vector<2x256xf32>
    %22 = arith.addf %20, %21 : vector<2x256xf32>
    %23 = arith.negf %22 : vector<2x256xf32>
    %24 = math.exp %23 : vector<2x256xf32>
    %cst_19 = arith.constant 1.000000e+00 : f32
    %25 = vector.broadcast %cst_19 : f32 to vector<2x256xf32>
    %26 = arith.addf %25, %24 : vector<2x256xf32>
    %27 = arith.divf %25, %26 : vector<2x256xf32>
    %28 = vector.extract_strided_slice %27 {offsets = [0, 0], sizes = [1, 128], strides = [1, 1]} : vector<2x256xf32> to vector<1x128xf32>
    %cst_20 = arith.constant 1.000000e+00 : f32
    %29 = vector.broadcast %cst_20 : f32 to vector<1x128xf32>
    %30 = arith.addf %29, %28 : vector<1x128xf32>
    %31 = vector.extract_strided_slice %27 {offsets = [1, 128], sizes = [1, 128], strides = [1, 1]} : vector<2x256xf32> to vector<1x128xf32>
    %cst_21 = arith.constant 1.000000e+00 : f32
    %32 = vector.broadcast %cst_21 : f32 to vector<1x128xf32>
    %33 = arith.addf %32, %31 : vector<1x128xf32>
    %34 = tpu.concatenate %1, %3 in 0 : vector<16x128xf32>, vector<8x128xf32> -> vector<24x128xf32>
    %35 = arith.truncf %34 : vector<24x128xf32> to vector<24x128xbf16>
    %cst_22 = arith.constant dense<0.000000e+00> : vector<24x768xf32>
    %36 = tpu.matmul %35, %5, %cst_22 {dimension_numbers = #tpu.dot_dimension_numbers<[1], [0], [0], [1], [0, 0, 1, 1], [], []>} : vector<24x128xbf16>, vector<128x768xbf16>, vector<24x768xf32> -> vector<24x768xf32>
    %37 = vector.broadcast %8 : vector<1x768xf32> to vector<24x768xf32>
    %38 = arith.addf %36, %37 : vector<24x768xf32>
    %cst_23 = arith.constant 0.000000e+00 : f32
    %39 = vector.broadcast %cst_23 : f32 to vector<24x768xf32>
    %40 = arith.maximumf %38, %39 : vector<24x768xf32>
    %41 = vector.extract_strided_slice %40 {offsets = [0, 0], sizes = [16, 384], strides = [1, 1]} : vector<24x768xf32> to vector<16x384xf32>
    %42 = vector.extract_strided_slice %40 {offsets = [16, 384], sizes = [8, 384], strides = [1, 1]} : vector<24x768xf32> to vector<8x384xf32>
    %43 = tpu.concatenate %33, %33, %33 in 1 : vector<1x128xf32>, vector<1x128xf32>, vector<1x128xf32> -> vector<1x384xf32>
    %44 = vector.broadcast %43 : vector<1x384xf32> to vector<16x384xf32>
    %45 = arith.mulf %41, %44 : vector<16x384xf32>
    %46 = tpu.concatenate %30, %30, %30 in 1 : vector<1x128xf32>, vector<1x128xf32>, vector<1x128xf32> -> vector<1x384xf32>
    %47 = vector.broadcast %46 : vector<1x384xf32> to vector<8x384xf32>
    %48 = arith.mulf %42, %47 : vector<8x384xf32>
    %49 = vector.extract_strided_slice %45 {offsets = [0, 0], sizes = [16, 128], strides = [1, 1]} : vector<16x384xf32> to vector<16x128xf32>
    %50 = vector.extract_strided_slice %45 {offsets = [0, 128], sizes = [16, 128], strides = [1, 1]} : vector<16x384xf32> to vector<16x128xf32>
    %51 = vector.extract_strided_slice %45 {offsets = [0, 256], sizes = [16, 128], strides = [1, 1]} : vector<16x384xf32> to vector<16x128xf32>
    %52 = vector.extract_strided_slice %50 {offsets = [0, 0], sizes = [16, 32], strides = [1, 1]} : vector<16x128xf32> to vector<16x32xf32>
    %53 = vector.extract_strided_slice %49 {offsets = [0, 0], sizes = [16, 32], strides = [1, 1]} : vector<16x128xf32> to vector<16x32xf32>
    %cst_24 = arith.constant dense<0.000000e+00> : vector<16x16xf32>
    %54 = tpu.matmul %52, %53, %cst_24 {dimension_numbers = #tpu.dot_dimension_numbers<[1], [1], [0], [0], [0, 0, 1, 0], [], []>} : vector<16x32xf32>, vector<16x32xf32>, vector<16x16xf32> -> vector<16x16xf32>
    %cst_25 = arith.constant dense<0xFF800000> : vector<16xf32>
    %55 = vector.multi_reduction <maximumf>, %54, %cst_25 [1] : vector<16x16xf32> to vector<16xf32>
    %56 = vector.shape_cast %55 : vector<16xf32> to vector<16x1xf32>
    %57 = vector.broadcast %56 : vector<16x1xf32> to vector<16x16xf32>
    %58 = arith.subf %54, %57 : vector<16x16xf32>
    %59 = math.exp %58 : vector<16x16xf32>
    %cst_26 = arith.constant dense<0.000000e+00> : vector<16xf32>
    %60 = vector.multi_reduction <add>, %59, %cst_26 [1] : vector<16x16xf32> to vector<16xf32>
    %61 = vector.shape_cast %60 : vector<16xf32> to vector<16x1xf32>
    %62 = tpu.reciprocal %61 {approx = true} : vector<16x1xf32> -> vector<16x1xf32>
    %63 = vector.broadcast %62 : vector<16x1xf32> to vector<16x16xf32>
    %64 = arith.mulf %59, %63 : vector<16x16xf32>
    %65 = vector.extract_strided_slice %51 {offsets = [0, 0], sizes = [16, 32], strides = [1, 1]} : vector<16x128xf32> to vector<16x32xf32>
    %cst_27 = arith.constant dense<0.000000e+00> : vector<16x32xf32>
    %66 = tpu.matmul %64, %65, %cst_27 {dimension_numbers = #tpu.dot_dimension_numbers<[1], [0], [0], [1], [0, 0, 1, 1], [], []>} : vector<16x16xf32>, vector<16x32xf32>, vector<16x32xf32> -> vector<16x32xf32>
    %67 = vector.extract_strided_slice %50 {offsets = [0, 32], sizes = [16, 32], strides = [1, 1]} : vector<16x128xf32> to vector<16x32xf32>
    %68 = vector.extract_strided_slice %49 {offsets = [0, 32], sizes = [16, 32], strides = [1, 1]} : vector<16x128xf32> to vector<16x32xf32>
    %cst_28 = arith.constant dense<0.000000e+00> : vector<16x16xf32>
    %69 = tpu.matmul %67, %68, %cst_28 {dimension_numbers = #tpu.dot_dimension_numbers<[1], [1], [0], [0], [0, 0, 1, 0], [], []>} : vector<16x32xf32>, vector<16x32xf32>, vector<16x16xf32> -> vector<16x16xf32>
    %cst_29 = arith.constant dense<0xFF800000> : vector<16xf32>
    %70 = vector.multi_reduction <maximumf>, %69, %cst_29 [1] : vector<16x16xf32> to vector<16xf32>
    %71 = vector.shape_cast %70 : vector<16xf32> to vector<16x1xf32>
    %72 = vector.broadcast %71 : vector<16x1xf32> to vector<16x16xf32>
    %73 = arith.subf %69, %72 : vector<16x16xf32>
    %74 = math.exp %73 : vector<16x16xf32>
    %cst_30 = arith.constant dense<0.000000e+00> : vector<16xf32>
    %75 = vector.multi_reduction <add>, %74, %cst_30 [1] : vector<16x16xf32> to vector<16xf32>
    %76 = vector.shape_cast %75 : vector<16xf32> to vector<16x1xf32>
    %77 = tpu.reciprocal %76 {approx = true} : vector<16x1xf32> -> vector<16x1xf32>
    %78 = vector.broadcast %77 : vector<16x1xf32> to vector<16x16xf32>
    %79 = arith.mulf %74, %78 : vector<16x16xf32>
    %80 = vector.extract_strided_slice %51 {offsets = [0, 32], sizes = [16, 32], strides = [1, 1]} : vector<16x128xf32> to vector<16x32xf32>
    %cst_31 = arith.constant dense<0.000000e+00> : vector<16x32xf32>
    %81 = tpu.matmul %79, %80, %cst_31 {dimension_numbers = #tpu.dot_dimension_numbers<[1], [0], [0], [1], [0, 0, 1, 1], [], []>} : vector<16x16xf32>, vector<16x32xf32>, vector<16x32xf32> -> vector<16x32xf32>
    %82 = vector.extract_strided_slice %50 {offsets = [0, 64], sizes = [16, 32], strides = [1, 1]} : vector<16x128xf32> to vector<16x32xf32>
    %83 = vector.extract_strided_slice %49 {offsets = [0, 64], sizes = [16, 32], strides = [1, 1]} : vector<16x128xf32> to vector<16x32xf32>
    %cst_32 = arith.constant dense<0.000000e+00> : vector<16x16xf32>
    %84 = tpu.matmul %82, %83, %cst_32 {dimension_numbers = #tpu.dot_dimension_numbers<[1], [1], [0], [0], [0, 0, 1, 0], [], []>} : vector<16x32xf32>, vector<16x32xf32>, vector<16x16xf32> -> vector<16x16xf32>
    %cst_33 = arith.constant dense<0xFF800000> : vector<16xf32>
    %85 = vector.multi_reduction <maximumf>, %84, %cst_33 [1] : vector<16x16xf32> to vector<16xf32>
    %86 = vector.shape_cast %85 : vector<16xf32> to vector<16x1xf32>
    %87 = vector.broadcast %86 : vector<16x1xf32> to vector<16x16xf32>
    %88 = arith.subf %84, %87 : vector<16x16xf32>
    %89 = math.exp %88 : vector<16x16xf32>
    %cst_34 = arith.constant dense<0.000000e+00> : vector<16xf32>
    %90 = vector.multi_reduction <add>, %89, %cst_34 [1] : vector<16x16xf32> to vector<16xf32>
    %91 = vector.shape_cast %90 : vector<16xf32> to vector<16x1xf32>
    %92 = tpu.reciprocal %91 {approx = true} : vector<16x1xf32> -> vector<16x1xf32>
    %93 = vector.broadcast %92 : vector<16x1xf32> to vector<16x16xf32>
    %94 = arith.mulf %89, %93 : vector<16x16xf32>
    %95 = vector.extract_strided_slice %51 {offsets = [0, 64], sizes = [16, 32], strides = [1, 1]} : vector<16x128xf32> to vector<16x32xf32>
    %cst_35 = arith.constant dense<0.000000e+00> : vector<16x32xf32>
    %96 = tpu.matmul %94, %95, %cst_35 {dimension_numbers = #tpu.dot_dimension_numbers<[1], [0], [0], [1], [0, 0, 1, 1], [], []>} : vector<16x16xf32>, vector<16x32xf32>, vector<16x32xf32> -> vector<16x32xf32>
    %97 = vector.extract_strided_slice %50 {offsets = [0, 96], sizes = [16, 32], strides = [1, 1]} : vector<16x128xf32> to vector<16x32xf32>
    %98 = vector.extract_strided_slice %49 {offsets = [0, 96], sizes = [16, 32], strides = [1, 1]} : vector<16x128xf32> to vector<16x32xf32>
    %cst_36 = arith.constant dense<0.000000e+00> : vector<16x16xf32>
    %99 = tpu.matmul %97, %98, %cst_36 {dimension_numbers = #tpu.dot_dimension_numbers<[1], [1], [0], [0], [0, 0, 1, 0], [], []>} : vector<16x32xf32>, vector<16x32xf32>, vector<16x16xf32> -> vector<16x16xf32>
    %cst_37 = arith.constant dense<0xFF800000> : vector<16xf32>
    %100 = vector.multi_reduction <maximumf>, %99, %cst_37 [1] : vector<16x16xf32> to vector<16xf32>
    %101 = vector.shape_cast %100 : vector<16xf32> to vector<16x1xf32>
    %102 = vector.broadcast %101 : vector<16x1xf32> to vector<16x16xf32>
    %103 = arith.subf %99, %102 : vector<16x16xf32>
    %104 = math.exp %103 : vector<16x16xf32>
    %cst_38 = arith.constant dense<0.000000e+00> : vector<16xf32>
    %105 = vector.multi_reduction <add>, %104, %cst_38 [1] : vector<16x16xf32> to vector<16xf32>
    %106 = vector.shape_cast %105 : vector<16xf32> to vector<16x1xf32>
    %107 = tpu.reciprocal %106 {approx = true} : vector<16x1xf32> -> vector<16x1xf32>
    %108 = vector.broadcast %107 : vector<16x1xf32> to vector<16x16xf32>
    %109 = arith.mulf %104, %108 : vector<16x16xf32>
    %110 = vector.extract_strided_slice %51 {offsets = [0, 96], sizes = [16, 32], strides = [1, 1]} : vector<16x128xf32> to vector<16x32xf32>
    %cst_39 = arith.constant dense<0.000000e+00> : vector<16x32xf32>
    %111 = tpu.matmul %109, %110, %cst_39 {dimension_numbers = #tpu.dot_dimension_numbers<[1], [0], [0], [1], [0, 0, 1, 1], [], []>} : vector<16x16xf32>, vector<16x32xf32>, vector<16x32xf32> -> vector<16x32xf32>
    %112 = tpu.concatenate %66, %81, %96, %111 in 1 : vector<16x32xf32>, vector<16x32xf32>, vector<16x32xf32>, vector<16x32xf32> -> vector<16x128xf32>
    %113 = vector.extract_strided_slice %48 {offsets = [0, 0], sizes = [8, 128], strides = [1, 1]} : vector<8x384xf32> to vector<8x128xf32>
    %114 = vector.extract_strided_slice %48 {offsets = [0, 128], sizes = [8, 128], strides = [1, 1]} : vector<8x384xf32> to vector<8x128xf32>
    %115 = vector.extract_strided_slice %48 {offsets = [0, 256], sizes = [8, 128], strides = [1, 1]} : vector<8x384xf32> to vector<8x128xf32>
    %116 = vector.extract_strided_slice %114 {offsets = [0, 0], sizes = [8, 32], strides = [1, 1]} : vector<8x128xf32> to vector<8x32xf32>
    %117 = vector.extract_strided_slice %113 {offsets = [0, 0], sizes = [8, 32], strides = [1, 1]} : vector<8x128xf32> to vector<8x32xf32>
    %cst_40 = arith.constant dense<0.000000e+00> : vector<8x8xf32>
    %118 = tpu.matmul %116, %117, %cst_40 {dimension_numbers = #tpu.dot_dimension_numbers<[1], [1], [0], [0], [0, 0, 1, 0], [], []>} : vector<8x32xf32>, vector<8x32xf32>, vector<8x8xf32> -> vector<8x8xf32>
    %cst_41 = arith.constant dense<0xFF800000> : vector<8xf32>
    %119 = vector.multi_reduction <maximumf>, %118, %cst_41 [1] : vector<8x8xf32> to vector<8xf32>
    %120 = vector.shape_cast %119 : vector<8xf32> to vector<8x1xf32>
    %121 = vector.broadcast %120 : vector<8x1xf32> to vector<8x8xf32>
    %122 = arith.subf %118, %121 : vector<8x8xf32>
    %123 = math.exp %122 : vector<8x8xf32>
    %cst_42 = arith.constant dense<0.000000e+00> : vector<8xf32>
    %124 = vector.multi_reduction <add>, %123, %cst_42 [1] : vector<8x8xf32> to vector<8xf32>
    %125 = vector.shape_cast %124 : vector<8xf32> to vector<8x1xf32>
    %126 = tpu.reciprocal %125 {approx = true} : vector<8x1xf32> -> vector<8x1xf32>
    %127 = vector.broadcast %126 : vector<8x1xf32> to vector<8x8xf32>
    %128 = arith.mulf %123, %127 : vector<8x8xf32>
    %129 = vector.extract_strided_slice %115 {offsets = [0, 0], sizes = [8, 32], strides = [1, 1]} : vector<8x128xf32> to vector<8x32xf32>
    %cst_43 = arith.constant dense<0.000000e+00> : vector<8x32xf32>
    %130 = tpu.matmul %128, %129, %cst_43 {dimension_numbers = #tpu.dot_dimension_numbers<[1], [0], [0], [1], [0, 0, 1, 1], [], []>} : vector<8x8xf32>, vector<8x32xf32>, vector<8x32xf32> -> vector<8x32xf32>
    %131 = vector.extract_strided_slice %114 {offsets = [0, 32], sizes = [8, 32], strides = [1, 1]} : vector<8x128xf32> to vector<8x32xf32>
    %132 = vector.extract_strided_slice %113 {offsets = [0, 32], sizes = [8, 32], strides = [1, 1]} : vector<8x128xf32> to vector<8x32xf32>
    %cst_44 = arith.constant dense<0.000000e+00> : vector<8x8xf32>
    %133 = tpu.matmul %131, %132, %cst_44 {dimension_numbers = #tpu.dot_dimension_numbers<[1], [1], [0], [0], [0, 0, 1, 0], [], []>} : vector<8x32xf32>, vector<8x32xf32>, vector<8x8xf32> -> vector<8x8xf32>
    %cst_45 = arith.constant dense<0xFF800000> : vector<8xf32>
    %134 = vector.multi_reduction <maximumf>, %133, %cst_45 [1] : vector<8x8xf32> to vector<8xf32>
    %135 = vector.shape_cast %134 : vector<8xf32> to vector<8x1xf32>
    %136 = vector.broadcast %135 : vector<8x1xf32> to vector<8x8xf32>
    %137 = arith.subf %133, %136 : vector<8x8xf32>
    %138 = math.exp %137 : vector<8x8xf32>
    %cst_46 = arith.constant dense<0.000000e+00> : vector<8xf32>
    %139 = vector.multi_reduction <add>, %138, %cst_46 [1] : vector<8x8xf32> to vector<8xf32>
    %140 = vector.shape_cast %139 : vector<8xf32> to vector<8x1xf32>
    %141 = tpu.reciprocal %140 {approx = true} : vector<8x1xf32> -> vector<8x1xf32>
    %142 = vector.broadcast %141 : vector<8x1xf32> to vector<8x8xf32>
    %143 = arith.mulf %138, %142 : vector<8x8xf32>
    %144 = vector.extract_strided_slice %115 {offsets = [0, 32], sizes = [8, 32], strides = [1, 1]} : vector<8x128xf32> to vector<8x32xf32>
    %cst_47 = arith.constant dense<0.000000e+00> : vector<8x32xf32>
    %145 = tpu.matmul %143, %144, %cst_47 {dimension_numbers = #tpu.dot_dimension_numbers<[1], [0], [0], [1], [0, 0, 1, 1], [], []>} : vector<8x8xf32>, vector<8x32xf32>, vector<8x32xf32> -> vector<8x32xf32>
    %146 = vector.extract_strided_slice %114 {offsets = [0, 64], sizes = [8, 32], strides = [1, 1]} : vector<8x128xf32> to vector<8x32xf32>
    %147 = vector.extract_strided_slice %113 {offsets = [0, 64], sizes = [8, 32], strides = [1, 1]} : vector<8x128xf32> to vector<8x32xf32>
    %cst_48 = arith.constant dense<0.000000e+00> : vector<8x8xf32>
    %148 = tpu.matmul %146, %147, %cst_48 {dimension_numbers = #tpu.dot_dimension_numbers<[1], [1], [0], [0], [0, 0, 1, 0], [], []>} : vector<8x32xf32>, vector<8x32xf32>, vector<8x8xf32> -> vector<8x8xf32>
    %cst_49 = arith.constant dense<0xFF800000> : vector<8xf32>
    %149 = vector.multi_reduction <maximumf>, %148, %cst_49 [1] : vector<8x8xf32> to vector<8xf32>
    %150 = vector.shape_cast %149 : vector<8xf32> to vector<8x1xf32>
    %151 = vector.broadcast %150 : vector<8x1xf32> to vector<8x8xf32>
    %152 = arith.subf %148, %151 : vector<8x8xf32>
    %153 = math.exp %152 : vector<8x8xf32>
    %cst_50 = arith.constant dense<0.000000e+00> : vector<8xf32>
    %154 = vector.multi_reduction <add>, %153, %cst_50 [1] : vector<8x8xf32> to vector<8xf32>
    %155 = vector.shape_cast %154 : vector<8xf32> to vector<8x1xf32>
    %156 = tpu.reciprocal %155 {approx = true} : vector<8x1xf32> -> vector<8x1xf32>
    %157 = vector.broadcast %156 : vector<8x1xf32> to vector<8x8xf32>
    %158 = arith.mulf %153, %157 : vector<8x8xf32>
    %159 = vector.extract_strided_slice %115 {offsets = [0, 64], sizes = [8, 32], strides = [1, 1]} : vector<8x128xf32> to vector<8x32xf32>
    %cst_51 = arith.constant dense<0.000000e+00> : vector<8x32xf32>
    %160 = tpu.matmul %158, %159, %cst_51 {dimension_numbers = #tpu.dot_dimension_numbers<[1], [0], [0], [1], [0, 0, 1, 1], [], []>} : vector<8x8xf32>, vector<8x32xf32>, vector<8x32xf32> -> vector<8x32xf32>
    %161 = vector.extract_strided_slice %114 {offsets = [0, 96], sizes = [8, 32], strides = [1, 1]} : vector<8x128xf32> to vector<8x32xf32>
    %162 = vector.extract_strided_slice %113 {offsets = [0, 96], sizes = [8, 32], strides = [1, 1]} : vector<8x128xf32> to vector<8x32xf32>
    %cst_52 = arith.constant dense<0.000000e+00> : vector<8x8xf32>
    %163 = tpu.matmul %161, %162, %cst_52 {dimension_numbers = #tpu.dot_dimension_numbers<[1], [1], [0], [0], [0, 0, 1, 0], [], []>} : vector<8x32xf32>, vector<8x32xf32>, vector<8x8xf32> -> vector<8x8xf32>
    %cst_53 = arith.constant dense<0xFF800000> : vector<8xf32>
    %164 = vector.multi_reduction <maximumf>, %163, %cst_53 [1] : vector<8x8xf32> to vector<8xf32>
    %165 = vector.shape_cast %164 : vector<8xf32> to vector<8x1xf32>
    %166 = vector.broadcast %165 : vector<8x1xf32> to vector<8x8xf32>
    %167 = arith.subf %163, %166 : vector<8x8xf32>
    %168 = math.exp %167 : vector<8x8xf32>
    %cst_54 = arith.constant dense<0.000000e+00> : vector<8xf32>
    %169 = vector.multi_reduction <add>, %168, %cst_54 [1] : vector<8x8xf32> to vector<8xf32>
    %170 = vector.shape_cast %169 : vector<8xf32> to vector<8x1xf32>
    %171 = tpu.reciprocal %170 {approx = true} : vector<8x1xf32> -> vector<8x1xf32>
    %172 = vector.broadcast %171 : vector<8x1xf32> to vector<8x8xf32>
    %173 = arith.mulf %168, %172 : vector<8x8xf32>
    %174 = vector.extract_strided_slice %115 {offsets = [0, 96], sizes = [8, 32], strides = [1, 1]} : vector<8x128xf32> to vector<8x32xf32>
    %cst_55 = arith.constant dense<0.000000e+00> : vector<8x32xf32>
    %175 = tpu.matmul %173, %174, %cst_55 {dimension_numbers = #tpu.dot_dimension_numbers<[1], [0], [0], [1], [0, 0, 1, 1], [], []>} : vector<8x8xf32>, vector<8x32xf32>, vector<8x32xf32> -> vector<8x32xf32>
    %176 = tpu.concatenate %130, %145, %160, %175 in 1 : vector<8x32xf32>, vector<8x32xf32>, vector<8x32xf32>, vector<8x32xf32> -> vector<8x128xf32>
    %177 = arith.addf %1, %112 : vector<16x128xf32>
    %178 = arith.addf %3, %176 : vector<8x128xf32>
    %179 = tpu.concatenate %177, %178 in 0 : vector<16x128xf32>, vector<8x128xf32> -> vector<24x128xf32>
    %180 = arith.truncf %179 : vector<24x128xf32> to vector<24x128xbf16>
    %cst_56 = arith.constant dense<0.000000e+00> : vector<24x256xf32>
    %181 = tpu.matmul %180, %6, %cst_56 {dimension_numbers = #tpu.dot_dimension_numbers<[1], [0], [0], [1], [0, 0, 1, 1], [], []>} : vector<24x128xbf16>, vector<128x256xbf16>, vector<24x256xf32> -> vector<24x256xf32>
    %182 = vector.broadcast %9 : vector<1x256xf32> to vector<24x256xf32>
    %183 = arith.addf %181, %182 : vector<24x256xf32>
    %cst_57 = arith.constant 0.000000e+00 : f32
    %184 = vector.broadcast %cst_57 : f32 to vector<24x256xf32>
    %185 = arith.maximumf %183, %184 : vector<24x256xf32>
    %186 = vector.extract_strided_slice %185 {offsets = [0, 0], sizes = [16, 128], strides = [1, 1]} : vector<24x256xf32> to vector<16x128xf32>
    %c0_58 = arith.constant 0 : index
    %c0_59 = arith.constant 0 : index
    %c0_60 = arith.constant 0 : index
    %187 = vector.load %arg5[%c0_58, %c0_59, %c0_60] : memref<1x16x128xf32, #tpu.memory_space<vmem>>, vector<1x16x128xf32>
    %188 = vector.shape_cast %187 : vector<1x16x128xf32> to vector<16x128xf32>
    %189 = vector.shape_cast %186 : vector<16x128xf32> to vector<1x16x128xf32>
    tpu.vector_store %arg5[%c0_58, %c0_59, %c0_60], %189 {strides = array<i32>} : memref<1x16x128xf32, #tpu.memory_space<vmem>>, vector<1x16x128xf32>,
    %190 = vector.extract_strided_slice %185 {offsets = [16, 128], sizes = [8, 128], strides = [1, 1]} : vector<24x256xf32> to vector<8x128xf32>
    %c0_61 = arith.constant 0 : index
    %c0_62 = arith.constant 0 : index
    %c0_63 = arith.constant 0 : index
    %191 = vector.load %arg6[%c0_61, %c0_62, %c0_63] : memref<1x8x128xf32, #tpu.memory_space<vmem>>, vector<1x8x128xf32>
    %192 = vector.shape_cast %191 : vector<1x8x128xf32> to vector<8x128xf32>
    %193 = vector.shape_cast %190 : vector<8x128xf32> to vector<1x8x128xf32>
    tpu.vector_store %arg6[%c0_61, %c0_62, %c0_63], %193 {strides = array<i32>} : memref<1x8x128xf32, #tpu.memory_space<vmem>>, vector<1x8x128xf32>,
    return
  }
  func.func @transform_0(%arg0: i32) -> (i32, i32, i32) {
    %c0_i32 = arith.constant 0 : i32
    %c0_i32_0 = arith.constant 0 : i32
    %c0_i32_1 = arith.constant 0 : i32
    return %arg0, %c0_i32, %c0_i32_0 : i32, i32, i32
  }
  func.func @transform_1(%arg0: i32) -> (i32, i32, i32) {
    %c0_i32 = arith.constant 0 : i32
    %c0_i32_0 = arith.constant 0 : i32
    %c0_i32_1 = arith.constant 0 : i32
    return %arg0, %c0_i32, %c0_i32_0 : i32, i32, i32
  }
  func.func @transform_2(%arg0: i32) -> (i32, i32) {
    %c0_i32 = arith.constant 0 : i32
    %c0_i32_0 = arith.constant 0 : i32
    %c0_i32_1 = arith.constant 0 : i32
    return %c0_i32, %c0_i32_0 : i32, i32
  }
  func.func @transform_3(%arg0: i32) -> (i32, i32) {
    %c0_i32 = arith.constant 0 : i32
    %c0_i32_0 = arith.constant 0 : i32
    %c0_i32_1 = arith.constant 0 : i32
    return %c0_i32, %c0_i32_0 : i32, i32
  }
  func.func @transform_4(%arg0: i32) -> (i32, i32, i32) {
    %c0_i32 = arith.constant 0 : i32
    %c0_i32_0 = arith.constant 0 : i32
    %c0_i32_1 = arith.constant 0 : i32
    return %arg0, %c0_i32, %c0_i32_0 : i32, i32, i32
  }
  func.func @transform_5(%arg0: i32) -> (i32, i32, i32) {
    %c0_i32 = arith.constant 0 : i32
    %c0_i32_0 = arith.constant 0 : i32
    %c0_i32_1 = arith.constant 0 : i32
    return %arg0, %c0_i32, %c0_i32_0 : i32, i32, i32
  }
}

</mosaic_0001>

<bundles_post_ra>
// kernel: tpu_custom_call.1
= control target key start
LH: loop header
LB: loop body
LE: loop exit
PB: predicated region body
PF: predicated region fallthrough
CT: control target
= control target key end

     0   :  { %s4237_s0 = inlined_call_operand.hbm [shape: f32[2,16,128], index: 0, kind: input, shape index: {}]   ;;  %s4238_s1 = inlined_call_operand.hbm [shape: f32[2,8,128], index: 1, kind: input, shape index: {}]   ;;  %s4239_s2 = inlined_call_operand.hbm [shape: bf16[128,1280], index: 2, kind: input, shape index: {}]   ;;  %s4240_s3 = inlined_call_operand.vmem [shape: f32[1,1280], index: 3, kind: input, shape index: {}]   ;;  %s4241_s4 = inlined_call_operand.hbm [shape: f32[2,16,128], index: 4, kind: output, shape index: {0}]   ;;  %s4242_s5 = inlined_call_operand.hbm [shape: f32[2,8,128], index: 5, kind: output, shape index: {1}]  }
   0x1   :  { %4247 = sst [smem:[#allocation17_spill]] %s4237_s0 }
   0x2   :  { %4248 = sst [smem:[#allocation18_spill]] %s4239_s2 }
   0x3   :  { %11 = vsyncpa [#allocation3], 0 }
   0x4   :  { %13 = vsyncpa [#allocation3 + $0x1], 0 }
   0x5   :  { %14 = vsyncpa [#allocation6], 0 }
   0x6   :  { %16 = vsyncpa [#allocation6 + $0x1], 0 }
   0x7   :  { %17 = vsyncpa [#allocation4], 0 }
   0x8   :  { %19 = vsyncpa [#allocation4 + $0x1], 0 }
   0x9   :  { %20 = vsyncpa [#allocation10], 0 }
   0xa   :  { %22 = vsyncpa [#allocation10 + $0x1], 0  ;;  %s3673_s18 = smov 0   ;;  %s3675_s19 = smov 0  }
   0xb   :  { %s3677_s20 = smov 0   ;;  %s3679_s21 = smov 0  }
   0xc LB: > { %s3694_s22 = sadd.s32 4294967295, %s3624_s21   ;;  %s2816_s23 = sadd.s32 4294967294, %s3624_s21   ;;  %s3624_s21 = sphi %s3679_s21, %s4272_s21   ;;  %s3620_s20 = sphi %s3677_s20, %s4271_s20   ;;  %s3616_s19 = sphi %s3675_s19, %s4270_s19   ;;  %s3612_s18 = sphi %s3673_s18, %s4269_s18  }
   0xd   : > { %p48_p0 = scmp.ne.s32.totalorder %s3616_s19, %s3612_s18  ;;  %p4243_p1 = scmp.eq.s32.totalorder %s3694_s22, 0 }
   0xe   : > { %p146_p3 = scmp.eq.s32.totalorder %s2816_s23, 1  ;;  %p2817_p5 = scmp.ge.s32.totalorder %s3624_s21, 1 }
   0xf   : > { %p3703_p4 = por %p4243_p1, %p48_p0  ;;  %p179_p7 = scmp.lt.s32.totalorder %s3624_s21, 3 }
  0x10   : > { %p3708_p6 = por %p146_p3, %p48_p0  ;;  %s3626_s27 = smov [#allocation7]  }
  0x11   : > { %s4249_s24 = scalar_select %p3703_p4, 1, 0 }
  0x12   : > { %s4250_s25 = scalar_select %p3708_p6, 1, 0 }
  0x13   : > { %p3713_p8 = pnand %p2817_p5, %p179_p7  ;;  %s191_s28 = sshll.u32 %s3626_s27, 4  ;;  %s3717_s28 = int_to_ptr.vmem [resolvable:$true] %s191_s28 }
  0x14   : > { %s3729_s30 = sadd.s32 1, %s3624_s21   ;;  %s35_s6 = sadd.s32 1, %s3620_s20 }
  0x15   : > { %s4251_s26 = scalar_select %p3713_p8, 1, 0 }
  0x16   : > { %p3154_p9 = pneg %p3713_p8  ;;  %s32_s7 = ssub.s32 %s3624_s21, %s3729_s30 }
  0x17   : > { %s4253_s2 = sld [smem:[#allocation18_spill]] }
  0x18   : > { %p3724_p11 = pnand %p3154_p9, %p4243_p1 }
  0x1a   : > { %p3432_p13 = pneg %p3724_p11 }
  0x1d   : > { %s3430_s10 = scalar_lea.hbm %s4253_s2, 10240 }
  0x1e   : > { %p3431_p12 = scmp.ne.s32.totalorder %s4253_s2, %s3430_s10  ;;  %p3437_p5 = scmp.lt.u32.totalorder %s3430_s10, %s4253_s2 }
  0x20   : > { %p3433_p0 = pnand %p3432_p13, %p3431_p12 }
  0x22   : > { %p3434_p3 = pneg %p3433_p0 }
  0x24   : > { %p3439_p7 = pnand %p3437_p5, %p3434_p3 }
  0x26   : > { %3442 = shalt.err (!%p3439_p7)
}
  0x27   : > { %s3443_s15 = scalar_lea.vmem %s3717_s28, 10240  ;;  %p3451_p2 = scmp.lt.s32.totalorder %s3717_s28, %s3717_s28 }
  0x28   : > { %p3444_p9 = scmp.ne.s32.totalorder %s3717_s28, %s3443_s15  ;;  %p3452_p6 = scmp.lt.s32.totalorder %s3443_s15, %s3443_s15 }
  0x2a   : > { %p3446_p10 = pnand %p3444_p9, %p3432_p13  ;;  %p3453_p4 = por %p3452_p6, %p3451_p2 }
  0x2c   : > { %p3447_p1 = pneg %p3446_p10 }
  0x2e   : > { %p3454_p8 = pnand %p3453_p4, %p3447_p1 }
  0x30   : > { %3457 = shalt.err (!%p3454_p8)
}
  0x31   : > { %s3627_s16 = smov 640   ;;  %s3628_s17 = smov 40  }
  0x32   : > { %3157 = dma.hbm_to_vmem [thread:$0]  (!%p3724_p11), %s4253_s2, 10240, %s3717_s28, [#allocation6], %s3627_s16, %s3627_s16, %s3628_s17  }
  0x33   : > { %p33_p2 = scmp.eq.s32.totalorder %s32_s7, 0  ;;  %p42_p1 = scmp.ne.s32.totalorder %s3620_s20, %s3616_s19 }
  0x34   : > { %p43_p4 = scmp.eq.s32.totalorder %s3624_s21, 0  ;;  %p3173_p6 = scmp.lt.s32.totalorder %s3624_s21, 2 }
  0x35   : > { %s3760_s8 = scalar_select %p33_p2, %s3620_s20, %s35_s6  }
  0x36   : > { %p44_p8 = por %p43_p4, %p42_p1  ;;  %p4255_p10 = scmp.eq.s32.totalorder %s3694_s22, 1 }
  0x37   : > { %4254 = sst [smem:[#allocation16_spill]] %s3760_s8  ;;  %s3769_s10 = sand.u32 1, %s3620_s20  }
  0x38   : > { %p3764_p12 = por %p4255_p10, %p42_p1  ;;  %s2956_s29 = sshll.u32 %s3624_s21, 8 }
  0x39   : > { %s2820_s11 = sshll.u32 %s3769_s10, 4  ;;  %s4257_s0 = sld [smem:[#allocation17_spill]] }
  0x3a   : > { %s4256_s9 = scalar_select %p3764_p12, 1, 0 }
  0x3b   : > { %s212_s6 = scalar_lea.vmem [#allocation2], %s2820_s11  ;;  %p3778_p11 = pnand %p3173_p6, %p44_p8 }
  0x3c   : > { %s219_s13 = sshll.u32 %s212_s6, 4  ;;  %s209_s15 = scalar_lea.sflag [#allocation3], %s3769_s10  ;;  %s3782_s13 = int_to_ptr.vmem [resolvable:$true] %s219_s13 }
  0x3d   : > { %p3460_p0 = pneg %p3778_p11 }
  0x3f   : > { %s3776_s7 = scalar_lea.hbm %s4257_s0, %s2956_s29  ;;  %s3463_s27 = scalar_lea.hbm %s4257_s0, 512 }
  0x40   : > { %s3458_s16 = scalar_lea.hbm %s3776_s7, 256  ;;  %p3464_p7 = scmp.lt.u32.totalorder %s3776_s7, %s4257_s0 }
  0x41   : > { %p3459_p13 = scmp.ne.s32.totalorder %s3776_s7, %s3458_s16  ;;  %p3465_p9 = scmp.lt.u32.totalorder %s3463_s27, %s3458_s16 }
  0x42   : > { %p3467_p1 = scmp.lt.u32.totalorder %s3458_s16, %s3776_s7 }
  0x43   : > { %p3461_p3 = pnand %p3460_p0, %p3459_p13  ;;  %p3466_p2 = por %p3465_p9, %p3464_p7 }
  0x45   : > { %p3462_p5 = pneg %p3461_p3  ;;  %p3468_p4 = por %p3467_p1, %p3466_p2 }
  0x47   : > { %p3469_p6 = pnand %p3468_p4, %p3462_p5 }
  0x49   : > { %3472 = shalt.err (!%p3469_p6)
}
  0x4a   : > { %s3473_s12 = scalar_lea.vmem %s3782_s13, 256  ;;  %s3629_s28 = smov [#allocation2]  }
  0x4b   : > { %p3474_p8 = scmp.ne.s32.totalorder %s3782_s13, %s3473_s12  ;;  %s3478_s6 = sshll.u32 %s3629_s28, 4  ;;  %s3479_s6 = int_to_ptr.vmem [resolvable:$false] %s3478_s6 }
  0x4c   : > { %s3480_s17 = scalar_lea.vmem %s3479_s6, 512  ;;  %p3481_p3 = scmp.lt.s32.totalorder %s3782_s13, %s3479_s6 }
  0x4d   : > { %p3476_p10 = pnand %p3474_p8, %p3460_p0  ;;  %p3482_p7 = scmp.lt.s32.totalorder %s3480_s17, %s3473_s12 }
  0x4f   : > { %p3477_p13 = pneg %p3476_p10  ;;  %p3483_p9 = por %p3482_p7, %p3481_p3 }
  0x51   : > { %p3484_p2 = pnand %p3483_p9, %p3477_p13 }
  0x53   : > { %3487 = shalt.err (!%p3484_p2)
}
  0x54   : > { %s3630_s16 = smov 128   ;;  %s3631_s23 = smov 8  }
  0x55   : > { %3161 = dma.hbm_to_vmem [thread:$0]  (!%p3778_p11), %s3776_s7, 256, %s3782_s13, %s209_s15, %s3630_s16, %s3630_s16, %s3631_s23  }
  0x56   : > { %s229_s27 = sand.u32 1, %s3624_s21   ;;  %s2823_s29 = sshll.u32 %s3769_s10, 3 }
  0x57   : > { %s2824_s11 = sshll.u32 %s3624_s21, 7  ;;  %s233_s12 = scalar_lea.vmem [#allocation5], %s2823_s29 }
  0x58   : > { %s240_s28 = sshll.u32 %s233_s12, 4  ;;  %s3818_s0 = scalar_lea.hbm %s4238_s1, %s2824_s11  ;;  %s241_s28 = int_to_ptr.vmem [resolvable:$true] %s240_s28 }
  0x59   : > { %s230_s2 = scalar_lea.sflag [#allocation6], %s229_s27  ;;  %s3488_s8 = scalar_lea.hbm %s3818_s0, 128 }
  0x5a   : > { %p3489_p5 = scmp.ne.s32.totalorder %s3818_s0, %s3488_s8  ;;  %s3493_s13 = scalar_lea.hbm %s4238_s1, 256 }
  0x5b   : > { %p3494_p6 = scmp.lt.u32.totalorder %s3818_s0, %s4238_s1  ;;  %p3495_p8 = scmp.lt.u32.totalorder %s3493_s13, %s3488_s8 }
  0x5c   : > { %p3491_p1 = pnand %p3489_p5, %p3460_p0  ;;  %p3497_p13 = scmp.lt.u32.totalorder %s3488_s8, %s3818_s0 }
  0x5d   : > { %p3496_p10 = por %p3495_p8, %p3494_p6 }
  0x5e   : > { %p3492_p4 = pneg %p3491_p1 }
  0x5f   : > { %p3498_p3 = por %p3497_p13, %p3496_p10 }
  0x61   : > { %p3499_p7 = pnand %p3498_p3, %p3492_p4 }
  0x63   : > { %3502 = shalt.err (!%p3499_p7)
}
  0x64   : > { %s3503_s23 = scalar_lea.vmem %s241_s28, 128  ;;  %s3632_s27 = smov [#allocation5]  }
  0x65   : > { %p3504_p9 = scmp.ne.s32.totalorder %s241_s28, %s3503_s23  ;;  %s3508_s29 = sshll.u32 %s3632_s27, 4  ;;  %s3509_s29 = int_to_ptr.vmem [resolvable:$false] %s3508_s29 }
  0x66   : > { %s3510_s11 = scalar_lea.vmem %s3509_s29, 256  ;;  %p3511_p1 = scmp.lt.s32.totalorder %s241_s28, %s3509_s29 }
  0x67   : > { %p3506_p2 = pnand %p3504_p9, %p3460_p0  ;;  %p3512_p12 = scmp.lt.s32.totalorder %s3510_s11, %s3503_s23 }
  0x69   : > { %p3507_p5 = pneg %p3506_p2  ;;  %p3513_p6 = por %p3512_p12, %p3511_p1 }
  0x6b   : > { %p3514_p8 = pnand %p3513_p6, %p3507_p5 }
  0x6d   : > { %3517 = shalt.err (!%p3514_p8)
}
  0x6e   : > { %3164 = dma.hbm_to_vmem [thread:$0]  (!%p3778_p11), %s3818_s0, 128, %s241_s28, %s230_s2  }
  0x6f   : > { %p4259_p4 = scmp.ne.s32.totalorder %s4251_s26, 0 }
  0x70   : > { %s3842_s8 = sand.u32 (!%p4259_p4), 1, %s3616_s19   ;;  %p4260_p12 = scmp.ne.s32.totalorder (!%p4259_p4), %s4249_s24, 0 }
  0x71   : > { %249 = sbr.rel (%p4259_p4) target bundleno = 3726 (0xe8e), region = 36  ;;  %s2826_s12 = sshll.u32 (!%p4259_p4), %s3842_s8, 4 }
  0x72   : > { %s252_s6 = scalar_lea.sflag (!%p4259_p4), [#allocation3], %s3842_s8  ;;  %s3848_s17 = scalar_lea.vmem (!%p4259_p4), [#allocation2], %s2826_s12 }
  0x78   : > { %3591 = dma.done.wait (%p4260_p12), %s252_s6, 256  }
  0x79   : > { %3593 = vsyncadd (%p4260_p12), %s252_s6, 4294967040  ;;  %s260_s0 = sand.u32 1, %s3694_s22   ;;  %s2827_s2 = sshll.u32 %s3842_s8, 3 }
  0x7a   : > { %s261_s26 = scalar_lea.sflag [#allocation6], %s260_s0  ;;  %s3858_s14 = scalar_lea.vmem [#allocation5], %s2827_s2 }
  0x7b   : > { %3595 = dma.done.wait (%p4260_p12), %s261_s26, 128  }
  0x7c   : > { %3597 = vsyncadd (%p4260_p12), %s261_s26, 4294967168  ;;  %p4261_p11 = scmp.eq.s32.totalorder %s3694_s22, 0 }
  0x7e   : > { %3599 = dma.done.wait (%p4261_p11), [#allocation6], 10240   ;;  %p4262_p0 = pmov %p4261_p11 }
  0x7f   : > { %v3633_v0 = vmov 0   ;;  %v3251_v1 = vld [vmem:[#allocation7 + $0x4] ss:$40 sps:$4 sm:$0xff]   ;;  %v3253_v2 = vld [vmem:[#allocation7] ss:$40 sps:$4 sm:$0xff]   ;;  %v3877_v19 = vld [vmem:[%s3858_s14] sm:$0xff] }
  0x80   : > { %3601 = vsyncadd (%p4262_p0), [#allocation6], 4294957056  ;;  %533 = vmatprep.mubr.bf16.mxu0 %v3633_v0  ;;  %958 = vmatprep.mubr.bf16.mxu1 %v3633_v0  ;;  %v3254_v3 = vld [vmem:[#allocation7 + $0x54] ss:$40 sps:$4 sm:$0xff]   ;;  %v3256_v4 = vld [vmem:[#allocation7 + $0x50] ss:$40 sps:$4 sm:$0xff]  }
  0x81   : > { %501 = vmatprep.subr.bf16.mxu0 %v3251_v1  ;;  %v3257_v5 = vld [vmem:[#allocation7 + $0xa4] ss:$40 sps:$4 sm:$0xff]   ;;  %v3259_v6 = vld [vmem:[#allocation7 + $0xa0] ss:$40 sps:$4 sm:$0xff]   ;;  %v3260_v7 = vld [vmem:[#allocation7 + $0xf4] ss:$40 sps:$4 sm:$0xff]   ;;  %v557_v1 = vpack.c.bf16 %v3877_v19, %v3877_v19 }
  0x82   : > { %502 = vmatpush1.bf16.msra.mxu0 %v3253_v2  ;;  %v3268_v8 = vld [vmem:[#allocation7 + $0x1c] ss:$40 sps:$4 sm:$0xff]   ;;  %v3271_v9 = vld [vmem:[#allocation7 + $0x18] ss:$40 sps:$4 sm:$0xff]   ;;  %v3274_v11 = vld [vmem:[#allocation7 + $0x6c] ss:$40 sps:$4 sm:$0xff]  }
  0x83   : > { %503 = vmatprep.subr.bf16.mxu0 %v3254_v3  ;;  %926 = vmatprep.subr.bf16.mxu1 %v3268_v8  ;;  %v3262_v10 = vld [vmem:[#allocation7 + $0xf0] ss:$40 sps:$4 sm:$0xff]   ;;  %v3263_v13 = vld [vmem:[#allocation7 + $0x144] ss:$40 sps:$4 sm:$0xff]   ;;  %v3265_v15 = vld [vmem:[#allocation7 + $0x140] ss:$40 sps:$4 sm:$0xff]  }
  0x84   : > { %927 = vmatpush1.bf16.msra.mxu1 %v3271_v9  ;;  %v3277_v12 = vld [vmem:[#allocation7 + $0x68] ss:$40 sps:$4 sm:$0xff]   ;;  %v3280_v14 = vld [vmem:[#allocation7 + $0xbc] ss:$40 sps:$4 sm:$0xff]   ;;  %v3283_v16 = vld [vmem:[#allocation7 + $0xb8] ss:$40 sps:$4 sm:$0xff]  }
  0x85   : > { %928 = vmatprep.subr.bf16.mxu1 %v3274_v11  ;;  %v3871_v17 = vld [vmem:[%s3848_s17] sm:$0xff]  ;;  %v3874_v18 = vld [vmem:[%s3848_s17 + $0x8] sm:$0xff]  ;;  %v400_v22 = vrot.slane %v3877_v19, 4  ;;  %vm407_vm0 = vcmask 1040384   ;;  %vm999_vm1 = vcmask 261120   ;;  %s3634_s13 = smov 96  }
  0x86   : > { %504 = vmatpush1.bf16.msra.mxu0 %v3256_v4  ;;  %v3266_v20 = vld [vmem:[#allocation7 + $0x194] ss:$40 sps:$4 sm:$0xff]   ;;  %v392_v21 = vadd.f32 %v3874_v18, %v3871_v17  ;;  %v3270_v26 = vld [vmem:[#allocation7 + $0x190] ss:$40 sps:$4 sm:$0xff]   ;;  %v3272_v28 = vld [vmem:[#allocation7 + $0x1e4] ss:$40 sps:$4 sm:$0xff]   ;;  %v3886_v58 = vpack.c.bf16 %v3874_v18, %v3871_v17 }
  0x87   : > { %505 = vmatprep.subr.bf16.mxu0 %v3257_v5  ;;  %v3287_v23 = vld [vmem:[#allocation7 + $0x10c] ss:$40 sps:$4 sm:$0xff]   ;;  %v401_v25 = vadd.f32 %v400_v22, %v3877_v19  ;;  %v3289_v27 = vld [vmem:[#allocation7 + $0x108] ss:$40 sps:$4 sm:$0xff]   ;;  %v3293_v31 = vld [vmem:[#allocation7 + $0x15c] ss:$40 sps:$4 sm:$0xff]  }
  0x88   : > { %929 = vmatpush1.bf16.msra.mxu1 %v3277_v12  ;;  %v393_v24 = vrot.slane %v392_v21, 4  ;;  %v3276_v34 = vld [vmem:[#allocation7 + $0x1e0] ss:$40 sps:$4 sm:$0xff]   ;;  %v3278_v36 = vld [vmem:[#allocation7 + $0x234] ss:$40 sps:$4 sm:$0xff]   ;;  %vm3939_vm2 = vmpackc.low %vm999_vm1, %vm999_vm1  ;;  %vm1087_vm3 = vcmask 130048  }
  0x89   : > { %930 = vmatprep.subr.bf16.mxu1 %v3280_v14  ;;  %v402_v30 = vrot.slane %v401_v25, 2  ;;  %v3295_v35 = vld [vmem:[#allocation7 + $0x158] ss:$40 sps:$4 sm:$0xff]   ;;  %v3299_v39 = vld [vmem:[#allocation7 + $0x1ac] ss:$40 sps:$4 sm:$0xff]   ;;  %s3635_s15 = smov 64  }
  0x8a   : > { %506 = vmatpush1.bf16.msra.mxu0 %v3259_v6  ;;  %v394_v29 = vadd.f32 %v393_v24, %v392_v21  ;;  %v3282_v42 = vld [vmem:[#allocation7 + $0x230] ss:$40 sps:$4 sm:$0xff]   ;;  %v3286_v46 = vld [vmem:[#allocation7 + $0xc] ss:$40 sps:$4 sm:$0xff]   ;;  %v3305_v47 = vld [vmem:[#allocation7 + $0x1fc] ss:$40 sps:$4 sm:$0xff]   ;;  %v411_v24 = vlaneseq }
  0x8b   : > { %507 = vmatprep.subr.bf16.mxu0 %v3260_v7  ;;  %v403_v33 = vadd.f32 %v402_v30, %v401_v25  ;;  %v3301_v43 = vld [vmem:[#allocation7 + $0x1a8] ss:$40 sps:$4 sm:$0xff]   ;;  %v3307_v49 = vld [vmem:[#allocation7 + $0x1f8] ss:$40 sps:$4 sm:$0xff]   ;;  %v3311_v52 = vld [vmem:[#allocation7 + $0x24c] ss:$40 sps:$4 sm:$0xff]  }
  0x8c   : > { %931 = vmatpush1.bf16.msra.mxu1 %v3283_v16  ;;  %v395_v32 = vrot.slane %v394_v29, 2  ;;  %v3284_v51 = vld [vmem:[#allocation7 + $0x8] ss:$40 sps:$4 sm:$0xff]   ;;  %v3292_v54 = vld [vmem:[#allocation7 + $0x5c] ss:$40 sps:$4 sm:$0xff]   ;;  %v3897_v25 = vshrl.u32 %v411_v24, 7 }
  0x8d   : > { %932 = vmatprep.subr.bf16.mxu1 %v3287_v23  ;;  %v404_v38 = vrot.slane %v403_v33, 1  ;;  %v3313_v55 = vld [vmem:[#allocation7 + $0x248] ss:$40 sps:$4 sm:$0xff]   ;;  %v3290_v56 = vld [vmem:[#allocation7 + $0x58] ss:$40 sps:$4 sm:$0xff]   ;;  %s3636_s16 = smov 32  }
  0x8e   : > { %508 = vmatpush1.bf16.msra.mxu0 %v3262_v10  ;;  %v396_v37 = vadd.f32 %v395_v32, %v394_v29  ;;  %v3298_v57 = vld [vmem:[#allocation7 + $0xac] ss:$40 sps:$4 sm:$0xff]   ;;  %v3296_v59 = vld [vmem:[#allocation7 + $0xa8] ss:$40 sps:$4 sm:$0xff]   ;;  %v3304_v60 = vld [vmem:[#allocation7 + $0xfc] ss:$40 sps:$4 sm:$0xff]  }
  0x8f   : > { %509 = vmatprep.subr.bf16.mxu0 %v3263_v13  ;;  %v405_v41 = vadd.f32 %v404_v38, %v403_v33  ;;  %v3302_v61 = vld [vmem:[#allocation7 + $0xf8] ss:$40 sps:$4 sm:$0xff]   ;;  %v3310_v62 = vld [vmem:[#allocation7 + $0x14c] ss:$40 sps:$4 sm:$0xff]   ;;  %v3308_v63 = vld [vmem:[#allocation7 + $0x148] ss:$40 sps:$4 sm:$0xff]  }
  0x90   : > { %933 = vmatpush1.bf16.msra.mxu1 %v3289_v27  ;;  %v397_v40 = vrot.slane %v396_v37, 1  ;;  %v3316_v2 = vld [vmem:[#allocation7 + $0x19c] ss:$40 sps:$4 sm:$0xff]   ;;  %v3314_v3 = vld [vmem:[#allocation7 + $0x198] ss:$40 sps:$4 sm:$0xff]   ;;  %vm3638_vm4 = vmmov 0  }
  0x91   : > { %934 = vmatprep.subr.bf16.mxu1 %v3293_v31  ;;  %v406_v45 = vmul.f32 0.125, %v405_v41  ;;  %v3319_v4 = vld [vmem:[#allocation7 + $0x1ec] ss:$40 sps:$4 sm:$0xff]   ;;  %v3317_v5 = vld [vmem:[#allocation7 + $0x1e8] ss:$40 sps:$4 sm:$0xff]   ;;  %v577_v41 = vsub.s32 4, %v3897_v25 }
  0x92   : > { %510 = vmatpush1.bf16.msra.mxu0 %v3265_v15  ;;  %v398_v44 = vadd.f32 %v397_v40, %v396_v37  ;;  %v3322_v6 = vld [vmem:[#allocation7 + $0x23c] ss:$40 sps:$4 sm:$0xff]   ;;  %v3320_v7 = vld [vmem:[#allocation7 + $0x238] ss:$40 sps:$4 sm:$0xff]   ;;  %v389_v27 = vld [vmem:[%s4240_s3] sm:$0x3] }
  0x93   : > { %511 = vmatprep.subr.bf16.mxu0 %v3266_v20  ;;  %v3325_v8 = vld [vmem:[#allocation7 + $0x14] ss:$40 sps:$4 sm:$0xff]   ;;  %v3323_v9 = vld [vmem:[#allocation7 + $0x10] ss:$40 sps:$4 sm:$0xff]   ;;  %v3328_v10 = vld [vmem:[#allocation7 + $0x64] ss:$40 sps:$4 sm:$0xff]  }
  0x94   : > { %935 = vmatpush1.bf16.msra.mxu1 %v3295_v35  ;;  %v399_v48 = vmul.f32 0.0625, %v398_v44  ;;  %v3326_v11 = vld [vmem:[#allocation7 + $0x60] ss:$40 sps:$4 sm:$0xff]   ;;  %v3331_v12 = vld [vmem:[#allocation7 + $0xb4] ss:$40 sps:$4 sm:$0xff]   ;;  %v581_v44 = vsub.s32 5, %v3897_v25 }
  0x95   : > { %936 = vmatprep.subr.bf16.mxu1 %v3299_v39  ;;  %v3329_v13 = vld [vmem:[#allocation7 + $0xb0] ss:$40 sps:$4 sm:$0xff]   ;;  %v3334_v14 = vld [vmem:[#allocation7 + $0x104] ss:$40 sps:$4 sm:$0xff]   ;;  %v3332_v15 = vld [vmem:[#allocation7 + $0x100] ss:$40 sps:$4 sm:$0xff]  }
  0x96   : > { %512 = vmatpush1.bf16.msra.mxu0 %v3270_v26  ;;  %v408_v50 = vsel %vm407_vm0, %v399_v48, %v406_v45  ;;  %v3337_v16 = vld [vmem:[#allocation7 + $0x154] ss:$40 sps:$4 sm:$0xff]   ;;  %v3335_v17 = vld [vmem:[#allocation7 + $0x150] ss:$40 sps:$4 sm:$0xff]   ;;  %v3340_v18 = vld [vmem:[#allocation7 + $0x1a4] ss:$40 sps:$4 sm:$0xff]  }
  0x97   : > { %513 = vmatprep.subr.bf16.mxu0 %v3272_v28  ;;  %v409_v53 = vpack.c.bf16 %v408_v50, %v408_v50  ;;  %v3338_v19 = vld [vmem:[#allocation7 + $0x1a0] ss:$40 sps:$4 sm:$0xff]   ;;  %v3343_v20 = vld [vmem:[#allocation7 + $0x1f4] ss:$40 sps:$4 sm:$0xff]   ;;  %v3341_v21 = vld [vmem:[#allocation7 + $0x1f0] ss:$40 sps:$4 sm:$0xff]  }
  0x98   : > { %937 = vmatpush1.bf16.msra.mxu1 %v3301_v43  ;;  %v3346_v22 = vld [vmem:[#allocation7 + $0x244] ss:$40 sps:$4 sm:$0xff]   ;;  %v3344_v23 = vld [vmem:[#allocation7 + $0x240] ss:$40 sps:$4 sm:$0xff]   ;;  %v3900_v26 = vsub.s32 0, %v3897_v25  ;;  %v3906_v28 = vsub.s32 1, %v3897_v25 }
  0x99   : > { %938 = vmatprep.subr.bf16.mxu1 %v3305_v47  ;;  %v3914_v43 = vld [vmem:[%s4240_s3 + $0x2] sm:$0x3f]  ;;  %vm1901_vm5 = vcmask 64512   ;;  %vm1819_vm6 = vcmask 523264   ;;  %vm1822_vm7 = vcmask 785408   ;;  %s297_s29 = scalar_lea.vmem [#allocation8], %s2826_s12 }
  0x9a   : > { %514 = vmatpush1.bf16.msra.mxu0 %v3276_v34  ;;  %v414_v29 = vrot.slane %v389_v27, %v3900_v26  ;;  %v418_v30 = vrot.slane %v389_v27, %v3906_v28  ;;  %v582_v47 = vrot.slane %v3914_v43, %v581_v44  ;;  %s2666_s11 = sshll.u32 %s297_s29, 4  ;;  %s2957_s12 = sshll.u32 %s3694_s22, 8  ;;  %s4153_s11 = int_to_ptr.vmem [resolvable:$true] %s2666_s11 }
  0x9b   : > { %515 = vmatprep.subr.bf16.mxu0 %v3278_v36  ;;  %s4159_s0 = scalar_lea.hbm %s4241_s4, %s2957_s12  ;;  %s2648_s26 = scalar_lea.sflag [#allocation4], %s3842_s8 }
  0x9c   : > { %939 = vmatpush1.bf16.msra.mxu1 %v3307_v49  ;;  %s3518_s24 = scalar_lea.vmem %s4153_s11, 256  ;;  %p4265_p13 = scmp.ne.s32.totalorder %s4256_s9, 0 }
  0x9d   : > { %940 = vmatprep.subr.bf16.mxu1 %v3311_v52  ;;  %p3519_p10 = scmp.ne.s32.totalorder %s4153_s11, %s3518_s24 }
  0x9e   : > { %516 = vmatpush1.bf16.msra.mxu0 %v3282_v42 }
  0x9f   : > { %829 = vmatprep.subr.bf16.mxu0 %v3286_v46  ;;  %v578_v46 = vrot.slane %v3914_v43, %v577_v41  ;;  %p3520_p3 = pnand %p3519_p10, %p4265_p13 }
  0xa0   : > { %941 = vmatpush1.bf16.msra.mxu1 %v3313_v55 }
  0xa1   : > { %534 = vmatmul.mubr.bf16.vlgmr.msra.gmra.mrb[0].mxu0 %v409_v53  ;;  %p3521_p7 = pneg %p3520_p3 }
  0xa2   : > { %830 = vmatpush1.bf16.msra.mxu0 %v3284_v51  ;;  %861 = vmatprep.mubr.bf16.mxu0 %v3633_v0 }
  0xa3   : > { %831 = vmatprep.subr.bf16.mxu0 %v3292_v54  ;;  %959 = vmatmul.mubr.bf16.vlgmr.msra.gmra.mrb[0].mxu1 %v3886_v58 }
  0xa4   : > { %964 = vmatprep.mubr.bf16.mxu1 %v3633_v0 }
  0xa6   : > { %832 = vmatpush1.bf16.msra.mxu0 %v3290_v56 }
  0xa7   : > { %833 = vmatprep.subr.bf16.mxu0 %v3298_v57 }
  0xaa   : > { %834 = vmatpush1.bf16.msra.mxu0 %v3296_v59 }
  0xab   : > { %835 = vmatprep.subr.bf16.mxu0 %v3304_v60  ;;  %965 = vmatmul.mubr.bf16.gmra.mrb[4].mxu1 %v557_v1 }
  0xae   : > { %836 = vmatpush1.bf16.msra.mxu0 %v3302_v61 }
  0xaf   : > { %837 = vmatprep.subr.bf16.mxu0 %v3310_v62 }
  0xb2   : > { %838 = vmatpush1.bf16.msra.mxu0 %v3308_v63  ;;  %v562_v63 = vrot.slane %v3914_v43, %v3900_v26 }
  0xb3   : > { %839 = vmatprep.subr.bf16.mxu0 %v3316_v2 }
  0xb6   : > { %840 = vmatpush1.bf16.msra.mxu0 %v3314_v3 }
  0xb7   : > { %841 = vmatprep.subr.bf16.mxu0 %v3319_v4 }
  0xba   : > { %842 = vmatpush1.bf16.msra.mxu0 %v3317_v5 }
  0xbb   : > { %843 = vmatprep.subr.bf16.mxu0 %v3322_v6 }
  0xbe   : > { %844 = vmatpush1.bf16.msra.mxu0 %v3320_v7 }
  0xbf   : > { %878 = vmatprep.subr.bf16.mxu0 %v3325_v8 }
  0xc1   : > { %862 = vmatmul.mubr.bf16.vlgmr.msra.gmra.mrb[4].mxu0 %v3886_v58 }
  0xc2   : > { %879 = vmatpush1.bf16.msra.mxu0 %v3323_v9  ;;  %871 = vmatprep.mubr.bf16.mxu0 %v3633_v0 }
  0xc3   : > { %880 = vmatprep.subr.bf16.mxu0 %v3328_v10 }
  0xc6   : > { %881 = vmatpush1.bf16.msra.mxu0 %v3326_v11 }
  0xc7   : > { %882 = vmatprep.subr.bf16.mxu0 %v3331_v12 }
  0xc9   : > { %872 = vmatmul.mubr.bf16.gmra.mrb[8].mxu0 %v557_v1 }
  0xca   : > { %883 = vmatpush1.bf16.msra.mxu0 %v3329_v13  ;;  %910 = vmatprep.mubr.bf16.mxu0 %v3633_v0 }
  0xcb   : > { %884 = vmatprep.subr.bf16.mxu0 %v3334_v14 }
  0xce   : > { %885 = vmatpush1.bf16.msra.mxu0 %v3332_v15 }
  0xcf   : > { %886 = vmatprep.subr.bf16.mxu0 %v3337_v16 }
  0xd2   : > { %887 = vmatpush1.bf16.msra.mxu0 %v3335_v17 }
  0xd3   : > { %888 = vmatprep.subr.bf16.mxu0 %v3340_v18 }
  0xd6   : > { %889 = vmatpush1.bf16.msra.mxu0 %v3338_v19 }
  0xd7   : > { %890 = vmatprep.subr.bf16.mxu0 %v3343_v20 }
  0xda   : > { %891 = vmatpush1.bf16.msra.mxu0 %v3341_v21 }
  0xdb   : > { %892 = vmatprep.subr.bf16.mxu0 %v3346_v22 }
  0xde   : > { %893 = vmatpush1.bf16.msra.mxu0 %v3344_v23 }
  0xe1   : > { %911 = vmatmul.mubr.bf16.vlgmr.msra.gmra.mrb[12].mxu0 %v3886_v58 }
  0xe2   : > { %918 = vmatprep.mubr.bf16.mxu0 %v3633_v0 }
  0xe9   : > { %919 = vmatmul.mubr.bf16.gmra.mrb[16].mxu0 %v557_v1  ;;  %v566_v1 = vrot.slane %v3914_v43, %v3906_v28 }
 0x174   : > { %v535_v31 = vpop.f32.mrb[0].mxu0 }
 0x175   : > { %v536_v32 = vadd.f32 %v535_v31, %v414_v29  ;;  %v537_v33 = vpop.f32.mrb[1].mxu0 }
 0x176   : > { %v538_v34 = vadd.f32 %v537_v33, %v418_v30  ;;  %v539_v35 = vpop.f32.mrb[2].mxu0  ;;  %v960_v39 = vpop.f32.mrb[0].mxu1  ;;  %v569_v33 = vsub.s32 2, %v3897_v25 }
 0x177   : > { %v2847_v36 = vmul.f32 -1.442695, %v536_v32  ;;  %v540_v37 = vpop.f32.mrb[3].mxu0  ;;  %v961_v40 = vpop.f32.mrb[1].mxu1  ;;  %v573_v39 = vsub.s32 3, %v3897_v25 }
 0x178   : > { %v2848_v38 = vmul.f32 -1.442695, %v538_v34  ;;  %v962_v42 = vpop.f32.mrb[2].mxu1  ;;  %v570_v34 = vrot.slane %v3914_v43, %v569_v33 }
 0x179   : > { %3371 = vpow2.f32 %v2847_v36  ;;  %v963_v45 = vpop.f32.mrb[3].mxu1 }
 0x17a   : > { %3373 = vpow2.f32 %v2848_v38 }
 0x17e   : > { %v966_v49 = vpop.f32.mrb[4].mxu1 }
 0x17f   : > { %v967_v52 = vadd.f32 %v966_v49, %v578_v46  ;;  %v968_v53 = vpop.f32.mrb[5].mxu1  ;;  %v574_v46 = vrot.slane %v3914_v43, %v573_v39 }
 0x180   : > { %v969_v55 = vadd.f32 %v968_v53, %v582_v47  ;;  %v970_v56 = vpop.f32.mrb[6].mxu1 }
 0x181   : > { %v971_v57 = vpop.f32.mrb[7].mxu1  ;;  %v980_v61 = vmax.f32 %v967_v52, 0.0 }
 0x182   : > { %v981_v62 = vmax.f32 %v969_v55, 0.0 }
 0x183   : > { %v3372_v48 = vpop.eup %3371 }
 0x184   : > { %v3374_v50 = vpop.eup %3373  ;;  %v548_v51 = vadd.f32 1.0, %v3372_v48 }
 0x185   : > { %v549_v54 = vadd.f32 1.0, %v3374_v50 }
 0x186   : > { %3375 = vrcp.f32 %v548_v51 }
 0x187   : > { %3377 = vrcp.f32 %v549_v54 }
 0x190   : > { %v3376_v58 = vpop.eup %3375 }
 0x191   : > { %v3378_v59 = vpop.eup %3377  ;;  %v554_v60 = vadd.f32 1.0, %v3376_v58 }
 0x192   : > { %v555_v2 = vadd.f32 1.0, %v3378_v59 }
 0x193   : > { %v995_v3 = vrot.slane %v554_v60, %v3900_v26 }
 0x194   : > { %v863_v4 = vpop.f32.mrb[4].mxu0  ;;  %v985_v11 = vrot.slane %v555_v2, %v3906_v28 }
 0x195   : > { %v3924_v5 = vmul.f32 %v995_v3, %v980_v61  ;;  %v3926_v6 = vmul.f32 %v995_v3, %v981_v62  ;;  %v864_v7 = vadd.f32 %v863_v4, %v562_v63  ;;  %v865_v8 = vpop.f32.mrb[5].mxu0 }
 0x196   : > { %v866_v9 = vadd.f32 %v865_v8, %v566_v1  ;;  %v867_v10 = vpop.f32.mrb[6].mxu0 }
 0x197   : > { %v973_v12 = vmax.f32 %v864_v7, 0.0  ;;  %v868_v13 = vadd.f32 %v867_v10, %v562_v63  ;;  %v869_v14 = vpop.f32.mrb[7].mxu0 }
 0x198   : > { %v974_v15 = vmax.f32 %v866_v9, 0.0  ;;  %v870_v16 = vadd.f32 %v869_v14, %v566_v1 }
 0x199   : > { %v986_v17 = vmul.f32 %v985_v11, %v973_v12  ;;  %v976_v18 = vmax.f32 %v868_v13, 0.0 }
 0x19a   : > { %v3929_v19 = vmul.f32 %v985_v11, %v974_v15  ;;  %v977_v20 = vmax.f32 %v870_v16, 0.0 }
 0x19b   : > { %v989_v21 = vmul.f32 %v985_v11, %v976_v18 }
 0x19c   : > { %v3931_v22 = vmul.f32 %v985_v11, %v977_v20  ;;  %1191 = vrot.lane.b32.xlu1 %v3929_v19, %s3634_s13  ;;  %3010 = vmatprep.mubr.msk.f32.mxu1 %vm999_vm1, %v3929_v19  ;;  %v873_v24 = vpop.f32.mrb[8].mxu0 }
 0x19d   : > { %v3102_v27 = vpack.c.bf16 %v989_v21, %v986_v17  ;;  %v874_v29 = vpop.f32.mrb[9].mxu0  ;;  %v3943_v30 = vpack.i.bf16 %v989_v21, %v986_v17 }
 0x19e   : > { %v875_v31 = vpop.f32.mrb[10].mxu0 }
 0x19f   : > { %3104 = vmatprep.subr.msk.bf16.mxu1 %vm3939_vm2, %v3102_v27  ;;  %v876_v32 = vpop.f32.mrb[11].mxu0 }
 0x1a0   : > { %3107 = vmatpush3.bf16.xpose.msk.msra.mxu1 %vm3939_vm2, %v3102_v27 }
 0x1a7   : > { %3011 = vmatmul.mubr.msk.f32.vlgmr.msra.gmra.mrb[8].mxu1 %vm999_vm1, %v3931_v22 }
 0x1b4   : > { %v912_v35 = vpop.f32.mrb[12].mxu0 }
 0x1b5   : > { %v913_v36 = vadd.f32 %v912_v35, %v570_v34  ;;  %v914_v37 = vpop.f32.mrb[13].mxu0 }
 0x1b6   : > { %v915_v38 = vpop.f32.mrb[14].mxu0 }
 0x1b7   : > { %v975_v40 = vmax.f32 %v913_v36, 0.0  ;;  %v916_v41 = vadd.f32 %v915_v38, %v570_v34  ;;  %v917_v42 = vpop.f32.mrb[15].mxu0 }
 0x1b9   : > { %v988_v44 = vmul.f32 %v985_v11, %v975_v40  ;;  %v978_v45 = vmax.f32 %v916_v41, 0.0 }
 0x1bb   : > { %v991_v47 = vmul.f32 %v985_v11, %v978_v45 }
 0x1bc   : > { %v920_v48 = vpop.f32.mrb[16].mxu0 }
 0x1bd   : > { %v921_v49 = vpop.f32.mrb[17].mxu0  ;;  %v3108_v50 = vpack.c.bf16 %v991_v47, %v988_v44  ;;  %v3955_v51 = vpack.i.bf16 %v991_v47, %v988_v44 }
 0x1be   : > { %v922_v52 = vadd.f32 %v921_v49, %v574_v46  ;;  %v923_v53 = vpop.f32.mrb[18].mxu0 }
 0x1bf   : > { %3109 = vmatprep.subr.bf16.mxu1 %v3108_v50  ;;  %v924_v54 = vpop.f32.mrb[19].mxu0 }
 0x1c0   : > { %v979_v55 = vmax.f32 %v922_v52, 0.0  ;;  %3111 = vmatpush3.bf16.msra.mxu1 %v3108_v50 }
 0x1c2   : > { %v3957_v25 = vmul.f32 %v995_v3, %v979_v55 }
 0x20e   : > { %v1192_v12 = vpop.permute.xlu1 %1191 }
 0x27a   : > { %v3012_v56 = vpop.f32.mrb[8].mxu1 }
 0x27b   : > { %v1078_v57 = vpop.f32.mrb[9].mxu1  ;;  %v1091_v43 = vsel %vm1087_vm3, %v3012_v56, -inf }
 0x27c   : > { %v1088_v58 = vsel %vm1087_vm3, %v1078_v57, -inf }
 0x27d   : > { %1089 = vmax.xlane.f32.xlu0 %v1088_v58 }
 0x281   : > { %1092 = vmax.xlane.f32.xlu0 %v1091_v43 }
 0x297   : > { %3222 = vrot.lane.b32.xlu0 %v3943_v30, %s3634_s13 }
 0x30a   : > { %v1090_v59 = vpop.xlane.xlu0 %1089 }
 0x30b   : > { %v1094_v60 = vsub.f32 %v1078_v57, %v1090_v59 }
 0x30d   : > { %v1096_v63 = vmul.f32 1.442695, %v1094_v60 }
 0x30e   : > { %v1093_v61 = vpop.xlane.xlu0 %1092 }
 0x30f   : > { %v1095_v62 = vsub.f32 %v3012_v56, %v1093_v61 }
 0x311   : > { %v1098_v1 = vmul.f32 1.442695, %v1095_v62 }
 0x312   : > { %v3223_v2 = vpop.permute.xlu0 %3222 }
 0x313   : > { %3379 = vpow2.f32 %v1098_v1  ;;  %v3225_v3 = vunpack.i.h.bf16 %v3223_v2  ;;  %v3224_v4 = vunpack.i.l.bf16 %v3223_v2 }
 0x314   : > { %3381 = vpow2.f32 %v1096_v63 }
 0x315   : > { %v3112_v7 = vpack.c.bf16 %v3225_v3, %v3224_v4 }
 0x317   : > { %3114 = vmatprep.subr.msk.bf16.mxu1 %vm3939_vm2, %v3112_v7 }
 0x31d   : > { %v3380_v8 = vpop.eup %3379 }
 0x31e   : > { %v1103_v9 = vsel %vm1087_vm3, %v3380_v8, 0.0  ;;  %v3382_v10 = vpop.eup %3381 }
 0x31f   : > { %1104 = vadd.xlane.f32.xlu1 %v1103_v9  ;;  %v1100_v11 = vsel %vm1087_vm3, %v3382_v10, 0.0 }
 0x323   : > { %1101 = vadd.xlane.f32.xlu1 %v1100_v11 }
 0x334   : > { %1193 = vrot.lane.b32.xlu1 %v3931_v22, %s3634_s13 }
 0x3ac   : > { %v1105_v13 = vpop.xlane.xlu1 %1104 }
 0x3ad   : > { %3383 = vrcp.f32 %v1105_v13 }
 0x3b0   : > { %v1102_v14 = vpop.xlane.xlu1 %1101 }
 0x3b1   : > { %3385 = vrcp.f32 %v1102_v14 }
 0x3b4   : > { %v1194_v20 = vpop.permute.xlu1 %1193 }
 0x3b7   : > { %v3384_v15 = vpop.eup %3383 }
 0x3b8   : > { %v1109_v18 = vmul.f32 %v3384_v15, %v3380_v8 }
 0x3bb   : > { %v3386_v16 = vpop.eup %3385 }
 0x3bc   : > { %v1108_v17 = vmul.f32 %v3386_v16, %v3382_v10 }
 0x3be   : > { %3017 = vmatprep.mubr.msk.f32.mxu1 %vm1087_vm3, %v1108_v17 }
 0x3bf   : > { %3018 = vmatmul.mubr.msk.f32.vlgmr.msra.gmra.mrb[10].mxu1 %vm1087_vm3, %v1109_v18 }
 0x3c0   : > { %3117 = vmatpush3.bf16.xpose.msk.msra.mxu1 %vm3939_vm2, %v3112_v7  ;;  %3024 = vmatprep.mubr.msk.f32.mxu1 %vm999_vm1, %v1192_v12 }
 0x3c7   : > { %3025 = vmatmul.mubr.msk.f32.vlgmr.msra.gmra.mrb[12].mxu1 %vm999_vm1, %v1194_v20 }
 0x492   : > { %v3975_v21 = vpop.f32.mrb[10].mxu1 }
 0x493   : > { %v3977_v24 = vpop.f32.mrb[11].mxu1 }
 0x49a   : > { %v3026_v27 = vpop.f32.mrb[12].mxu1 }
 0x49b   : > { %v1273_v29 = vpop.f32.mrb[13].mxu1  ;;  %v1285_v31 = vsel %vm1087_vm3, %v3026_v27, -inf }
 0x49c   : > { %1286 = vmax.xlane.f32.xlu0 %v1285_v31  ;;  %v1282_v32 = vsel %vm1087_vm3, %v1273_v29, -inf }
 0x49d   : > { %1283 = vmax.xlane.f32.xlu1 %v1282_v32 }
 0x4ae   : > { %3227 = vrot.lane.b32.xlu1 %v3955_v51, %s3634_s13 }
 0x4b2   : > { %1393 = vrot.lane.b32.xlu1 %v3929_v19, %s3635_s15 }
 0x4b6   : > { %1395 = vrot.lane.b32.xlu1 %v3931_v22, %s3635_s15 }
 0x529   : > { %v1287_v33 = vpop.xlane.xlu0 %1286 }
 0x52a   : > { %v1289_v34 = vsub.f32 %v3026_v27, %v1287_v33  ;;  %v1284_v35 = vpop.xlane.xlu1 %1283 }
 0x52b   : > { %v1288_v36 = vsub.f32 %v1273_v29, %v1284_v35 }
 0x52c   : > { %v1292_v37 = vmul.f32 1.442695, %v1289_v34 }
 0x52d   : > { %v1290_v38 = vmul.f32 1.442695, %v1288_v36 }
 0x52e   : > { %3387 = vpow2.f32 %v1292_v37  ;;  %v3228_v39 = vpop.permute.xlu1 %3227 }
 0x52f   : > { %v3230_v40 = vunpack.i.h.bf16 %v3228_v39  ;;  %v3229_v41 = vunpack.i.l.bf16 %v3228_v39  ;;  %3389 = vpow2.f32 %v1290_v38 }
 0x531   : > { %v3118_v42 = vpack.c.bf16 %v3230_v40, %v3229_v41 }
 0x532   : > { %v1394_v43 = vpop.permute.xlu1 %1393 }
 0x533   : > { %3119 = vmatprep.subr.bf16.mxu1 %v3118_v42 }
 0x534   : > { %3121 = vmatpush3.bf16.msra.mxu1 %v3118_v42 }
 0x536   : > { %v1396_v59 = vpop.permute.xlu1 %1395 }
 0x538   : > { %v3388_v44 = vpop.eup %3387 }
 0x539   : > { %v1297_v45 = vsel %vm1087_vm3, %v3388_v44, 0.0  ;;  %v3390_v46 = vpop.eup %3389 }
 0x53a   : > { %1298 = vadd.xlane.f32.xlu0 %v1297_v45  ;;  %v1294_v47 = vsel %vm1087_vm3, %v3390_v46, 0.0 }
 0x53e   : > { %1295 = vadd.xlane.f32.xlu0 %v1294_v47 }
 0x554   : > { %3232 = vrot.lane.b32.xlu0 %v3943_v30, %s3635_s15 }
 0x5c7   : > { %v1299_v48 = vpop.xlane.xlu0 %1298 }
 0x5c8   : > { %3391 = vrcp.f32 %v1299_v48 }
 0x5cb   : > { %v1296_v49 = vpop.xlane.xlu0 %1295 }
 0x5cc   : > { %3393 = vrcp.f32 %v1296_v49 }
 0x5cf   : > { %v3233_v50 = vpop.permute.xlu0 %3232 }
 0x5d0   : > { %v3235_v52 = vunpack.i.h.bf16 %v3233_v50  ;;  %v3234_v53 = vunpack.i.l.bf16 %v3233_v50 }
 0x5d2   : > { %v3122_v54 = vpack.c.bf16 %v3235_v52, %v3234_v53  ;;  %v3392_v55 = vpop.eup %3391 }
 0x5d3   : > { %v1303_v58 = vmul.f32 %v3392_v55, %v3388_v44 }
 0x5d4   : > { %3124 = vmatprep.subr.msk.bf16.mxu1 %vm3939_vm2, %v3122_v54 }
 0x5d6   : > { %v3394_v56 = vpop.eup %3393 }
 0x5d7   : > { %v1302_v57 = vmul.f32 %v3394_v56, %v3390_v46 }
 0x5d9   : > { %3031 = vmatprep.mubr.msk.f32.mxu1 %vm1087_vm3, %v1302_v57 }
 0x5da   : > { %3032 = vmatmul.mubr.msk.f32.vlgmr.msra.gmra.mrb[14].mxu1 %vm1087_vm3, %v1303_v58 }
 0x5db   : > { %3127 = vmatpush3.bf16.xpose.msk.msra.mxu1 %vm3939_vm2, %v3122_v54  ;;  %3038 = vmatprep.mubr.msk.f32.mxu1 %vm999_vm1, %v1394_v43 }
 0x5e2   : > { %3039 = vmatmul.mubr.msk.f32.vlgmr.msra.gmra.mrb[16].mxu1 %vm999_vm1, %v1396_v59 }
 0x6ad   : > { %v3999_v60 = vpop.f32.mrb[14].mxu1 }
 0x6ae   : > { %v4001_v61 = vpop.f32.mrb[15].mxu1 }
 0x6b5   : > { %v3040_v62 = vpop.f32.mrb[16].mxu1 }
 0x6b6   : > { %v1475_v63 = vpop.f32.mrb[17].mxu1  ;;  %v1487_v1 = vsel %vm1087_vm3, %v3040_v62, -inf }
 0x6b7   : > { %1488 = vmax.xlane.f32.xlu0 %v1487_v1  ;;  %v1484_v2 = vsel %vm1087_vm3, %v1475_v63, -inf }
 0x6b8   : > { %1485 = vmax.xlane.f32.xlu1 %v1484_v2 }
 0x6c9   : > { %3237 = vrot.lane.b32.xlu1 %v3955_v51, %s3635_s15 }
 0x6cd   : > { %1593 = vrot.lane.b32.xlu1 %v3929_v19, %s3636_s16 }
 0x6d1   : > { %1595 = vrot.lane.b32.xlu1 %v3931_v22, %s3636_s16 }
 0x744   : > { %v1489_v3 = vpop.xlane.xlu0 %1488 }
 0x745   : > { %v1491_v4 = vsub.f32 %v3040_v62, %v1489_v3  ;;  %v1486_v7 = vpop.xlane.xlu1 %1485 }
 0x746   : > { %v1490_v8 = vsub.f32 %v1475_v63, %v1486_v7 }
 0x747   : > { %v1494_v9 = vmul.f32 1.442695, %v1491_v4 }
 0x748   : > { %v1492_v10 = vmul.f32 1.442695, %v1490_v8 }
 0x749   : > { %3395 = vpow2.f32 %v1494_v9  ;;  %v3238_v11 = vpop.permute.xlu1 %3237 }
 0x74a   : > { %v3240_v12 = vunpack.i.h.bf16 %v3238_v11  ;;  %v3239_v13 = vunpack.i.l.bf16 %v3238_v11  ;;  %3397 = vpow2.f32 %v1492_v10 }
 0x74c   : > { %v3128_v14 = vpack.c.bf16 %v3240_v12, %v3239_v13 }
 0x74d   : > { %v1594_v36 = vpop.permute.xlu1 %1593 }
 0x74e   : > { %3129 = vmatprep.subr.bf16.mxu0 %v3128_v14 }
 0x74f   : > { %3131 = vmatpush3.bf16.msra.mxu0 %v3128_v14 }
 0x751   : > { %v1596_v37 = vpop.permute.xlu1 %1595 }
 0x753   : > { %v3396_v15 = vpop.eup %3395 }
 0x754   : > { %v1499_v19 = vsel %vm1087_vm3, %v3396_v15, 0.0  ;;  %v3398_v16 = vpop.eup %3397 }
 0x755   : > { %1500 = vadd.xlane.f32.xlu0 %v1499_v19  ;;  %v1496_v22 = vsel %vm1087_vm3, %v3398_v16, 0.0 }
 0x759   : > { %1497 = vadd.xlane.f32.xlu0 %v1496_v22 }
 0x76f   : > { %3242 = vrot.lane.b32.xlu0 %v3943_v30, %s3636_s16  ;;  %v3637_v30 = vmov 0.0  }
 0x7e2   : > { %v1501_v17 = vpop.xlane.xlu0 %1500 }
 0x7e3   : > { %3399 = vrcp.f32 %v1501_v17 }
 0x7e6   : > { %v1498_v18 = vpop.xlane.xlu0 %1497 }
 0x7e7   : > { %3401 = vrcp.f32 %v1498_v18 }
 0x7ea   : > { %v3243_v20 = vpop.permute.xlu0 %3242 }
 0x7eb   : > { %v3245_v27 = vunpack.i.h.bf16 %v3243_v20  ;;  %v3244_v29 = vunpack.i.l.bf16 %v3243_v20 }
 0x7ed   : > { %v3132_v31 = vpack.c.bf16 %v3245_v27, %v3244_v29  ;;  %v3400_v32 = vpop.eup %3399 }
 0x7ee   : > { %v1505_v35 = vmul.f32 %v3400_v32, %v3396_v15 }
 0x7ef   : > { %3134 = vmatprep.subr.msk.bf16.mxu0 %vm3939_vm2, %v3132_v31 }
 0x7f1   : > { %v3402_v33 = vpop.eup %3401 }
 0x7f2   : > { %v1504_v34 = vmul.f32 %v3402_v33, %v3398_v16 }
 0x7f4   : > { %3045 = vmatprep.mubr.msk.f32.mxu0 %vm1087_vm3, %v1504_v34 }
 0x7f5   : > { %3046 = vmatmul.mubr.msk.f32.vlgmr.msra.gmra.mrb[20].mxu0 %vm1087_vm3, %v1505_v35 }
 0x7f6   : > { %3137 = vmatpush3.bf16.xpose.msk.msra.mxu0 %vm3939_vm2, %v3132_v31  ;;  %3052 = vmatprep.mubr.msk.f32.mxu0 %vm999_vm1, %v1594_v36 }
 0x7f7   : > { %3067 = vmatprep.subr.mxu0 %v3637_v30 }
 0x7fd   : > { %3053 = vmatmul.mubr.msk.f32.vlgmr.msra.gmra.mrb[22].mxu0 %vm999_vm1, %v1596_v37 }
 0x7fe   : > { %3068 = vmatpush3.msra.mxu0 %v3926_v6  ;;  %3069 = vmatprep.mubr.msk.f32.mxu0 %vm3638_vm4, %v3637_v30 }
 0x7ff   : > { %3077 = vmatprep.subr.mxu0 %v3637_v30 }
 0x8c8   : > { %v4026_v38 = vpop.f32.mrb[20].mxu0 }
 0x8c9   : > { %v4028_v39 = vpop.f32.mrb[21].mxu0 }
 0x8d0   : > { %v3054_v40 = vpop.f32.mrb[22].mxu0 }
 0x8d1   : > { %v1675_v41 = vpop.f32.mrb[23].mxu0  ;;  %v1687_v23 = vsel %vm1087_vm3, %v3054_v40, -inf }
 0x8d2   : > { %1688 = vmax.xlane.f32.xlu0 %v1687_v23  ;;  %v1684_v42 = vsel %vm1087_vm3, %v1675_v41, -inf }
 0x8d3   : > { %1685 = vmax.xlane.f32.xlu1 %v1684_v42 }
 0x8e4   : > { %3247 = vrot.lane.b32.xlu1 %v3955_v51, %s3636_s16 }
 0x8e8   : > { %1986 = vrot.lane.b32.xlu1 %v3924_v5, %s3634_s13 }
 0x8ec   : > { %2154 = vrot.lane.b32.xlu1 %v3957_v25, %s3635_s15 }
 0x8f0   : > { %2152 = vrot.lane.b32.xlu1 %v3924_v5, %s3635_s15 }
 0x8f4   : > { %2317 = vrot.lane.b32.xlu1 %v3924_v5, %s3636_s16 }
 0x95f   : > { %v1689_v44 = vpop.xlane.xlu0 %1688 }
 0x960   : > { %v1691_v45 = vsub.f32 %v3054_v40, %v1689_v44  ;;  %v1686_v46 = vpop.xlane.xlu1 %1685 }
 0x961   : > { %v1690_v47 = vsub.f32 %v1675_v41, %v1686_v46 }
 0x962   : > { %v1694_v48 = vmul.f32 1.442695, %v1691_v45 }
 0x963   : > { %v1692_v49 = vmul.f32 1.442695, %v1690_v47 }
 0x964   : > { %v3248_v50 = vpop.permute.xlu1 %3247 }
 0x965   : > { %3403 = vpow2.f32 %v1692_v49  ;;  %v3250_v51 = vunpack.i.h.bf16 %v3248_v50  ;;  %v3249_v52 = vunpack.i.l.bf16 %v3248_v50  ;;  %v3347_v49 = vld [vmem:[#allocation7 + $0x20] ss:$40 sps:$4 sm:$0xff]   ;;  %v3349_v50 = vld [vmem:[#allocation7 + $0x24] ss:$40 sps:$4 sm:$0xff]  }
 0x966   : > { %3405 = vpow2.f32 %v1694_v48 }
 0x967   : > { %v3138_v53 = vpack.c.bf16 %v3250_v51, %v3249_v52  ;;  %v3352_v51 = vld [vmem:[#allocation7 + $0x74] ss:$40 sps:$4 sm:$0xff]   ;;  %v3350_v52 = vld [vmem:[#allocation7 + $0x70] ss:$40 sps:$4 sm:$0xff]  }
 0x968   : > { %v1987_v1 = vpop.permute.xlu1 %1986 }
 0x969   : > { %3139 = vmatprep.subr.bf16.mxu1 %v3138_v53 }
 0x96a   : > { %3141 = vmatpush3.bf16.msra.mxu1 %v3138_v53  ;;  %v3355_v53 = vld [vmem:[#allocation7 + $0xc4] ss:$40 sps:$4 sm:$0xff]  }
 0x96b   : > { %3062 = vmatprep.subr.mxu1 %v3637_v30 }
 0x96c   : > { %v2155_v3 = vpop.permute.xlu1 %2154 }
 0x96f   : > { %v3404_v54 = vpop.eup %3403 }
 0x970   : > { %v1696_v55 = vsel %vm1087_vm3, %v3404_v54, 0.0  ;;  %v3406_v56 = vpop.eup %3405 }
 0x971   : > { %1697 = vadd.xlane.f32.xlu0 %v1696_v55  ;;  %v1699_v57 = vsel %vm1087_vm3, %v3406_v56, 0.0 }
 0x975   : > { %1700 = vadd.xlane.f32.xlu0 %v1699_v57  ;;  %v3361_v57 = vld [vmem:[#allocation7 + $0x164] ss:$40 sps:$4 sm:$0xff]  }
 0x98b   : > { %1988 = vrot.lane.b32.xlu0 %v3957_v25, %s3634_s13 }
 0x98f   : > { %2319 = vrot.lane.b32.xlu0 %v3957_v25, %s3636_s16 }
 0x9fe   : > { %v1698_v58 = vpop.xlane.xlu0 %1697 }
 0x9ff   : > { %3407 = vrcp.f32 %v1698_v58  ;;  %v3359_v58 = vld [vmem:[#allocation7 + $0x160] ss:$40 sps:$4 sm:$0xff]  }
 0xa02   : > { %v1701_v43 = vpop.xlane.xlu0 %1700 }
 0xa03   : > { %3409 = vrcp.f32 %v1701_v43  ;;  %v3364_v43 = vld [vmem:[#allocation7 + $0x1b4] ss:$40 sps:$4 sm:$0xff]  }
 0xa06   : > { %v1989_v4 = vpop.permute.xlu0 %1988 }
 0xa09   : > { %v3408_v59 = vpop.eup %3407 }
 0xa0a   : > { %v1704_v62 = vmul.f32 %v3408_v59, %v3404_v54  ;;  %v2320_v7 = vpop.permute.xlu0 %2319  ;;  %v3353_v54 = vld [vmem:[#allocation7 + $0xc0] ss:$40 sps:$4 sm:$0xff]   ;;  %v3362_v59 = vld [vmem:[#allocation7 + $0x1b0] ss:$40 sps:$4 sm:$0xff]  }
 0xa0c   : > { %3059 = vmatprep.mubr.msk.f32.mxu1 %vm1087_vm3, %v1704_v62  ;;  %v3367_v62 = vld [vmem:[#allocation7 + $0x204] ss:$40 sps:$4 sm:$0xff]  }
 0xa0d   : > { %v3410_v63 = vpop.eup %3409 }
 0xa0e   : > { %v1705_v2 = vmul.f32 %v3410_v63, %v3406_v56  ;;  %v3356_v56 = vld [vmem:[#allocation7 + $0x110] ss:$40 sps:$4 sm:$0xff]   ;;  %v3365_v63 = vld [vmem:[#allocation7 + $0x200] ss:$40 sps:$4 sm:$0xff]  }
 0xa10   : > { %3060 = vmatmul.mubr.msk.f32.vlgmr.msra.gmra.mrb[18].mxu1 %vm1087_vm3, %v1705_v2 }
 0xa11   : > { %3063 = vmatpush3.xpose.msk.msra.mxu1 %vm999_vm1, %v3957_v25  ;;  %3064 = vmatprep.mubr.msk.f32.mxu1 %vm3638_vm4, %v3637_v30  ;;  %v2153_v25 = vpop.permute.xlu1 %2152 }
 0xa12   : > { %3072 = vmatprep.subr.mxu1 %v3637_v30 }
 0xa14   : > { %3065 = vmatmul.mubr.msk.f32.vlgmr.msra.gmra.mrb[20].mxu1 %vm999_vm1, %v3924_v5 }
 0xa15   : > { %3073 = vmatpush3.xpose.msk.msra.mxu1 %vm999_vm1, %v1989_v4  ;;  %3074 = vmatprep.mubr.msk.f32.mxu1 %vm3638_vm4, %v3637_v30  ;;  %v2318_v5 = vpop.permute.xlu1 %2317 }
 0xa16   : > { %3082 = vmatprep.subr.mxu1 %v3637_v30 }
 0xa18   : > { %3075 = vmatmul.mubr.msk.f32.vlgmr.msra.gmra.mrb[22].mxu1 %vm999_vm1, %v1987_v1  ;;  %v3368_v1 = vld [vmem:[#allocation7 + $0x250] ss:$40 sps:$4 sm:$0xff]  }
 0xa19   : > { %3083 = vmatpush3.xpose.msk.msra.mxu1 %vm999_vm1, %v2155_v3  ;;  %3084 = vmatprep.mubr.msk.f32.mxu1 %vm3638_vm4, %v3637_v30 }
 0xa1a   : > { %3092 = vmatprep.subr.mxu1 %v3637_v30 }
 0xa1c   : > { %3085 = vmatmul.mubr.msk.f32.vlgmr.msra.gmra.mrb[24].mxu1 %vm999_vm1, %v2153_v25 }
 0xa1d   : > { %3093 = vmatpush3.xpose.msk.msra.mxu1 %vm999_vm1, %v2320_v7  ;;  %3094 = vmatprep.mubr.msk.f32.mxu1 %vm3638_vm4, %v3637_v30 }
 0xa1e   : > { %2593 = vmatprep.subr.bf16.mxu1 %v3349_v50 }
 0xa20   : > { %3095 = vmatmul.mubr.msk.f32.vlgmr.msra.gmra.mrb[26].mxu1 %vm999_vm1, %v2318_v5 }
 0xa21   : > { %2625 = vmatprep.mubr.bf16.mxu1 %v3633_v0  ;;  %2594 = vmatpush1.bf16.msra.mxu1 %v3347_v49 }
 0xa22   : > { %2595 = vmatprep.subr.bf16.mxu1 %v3352_v51 }
 0xa25   : > { %2596 = vmatpush1.bf16.msra.mxu1 %v3350_v52 }
 0xa26   : > { %2597 = vmatprep.subr.bf16.mxu1 %v3355_v53 }
 0xa29   : > { %2598 = vmatpush1.bf16.msra.mxu1 %v3353_v54 }
 0xae3   : > { %v3061_v8 = vpop.f32.mrb[18].mxu1 }
 0xae4   : > { %v4075_v9 = vpop.f32.mrb[19].mxu1 }
 0xae7   : > { %v1897_v10 = vpop.f32.mrb[20].mxu1 }
 0xae8   : > { %v3066_v11 = vpop.f32.mrb[21].mxu1  ;;  %v1902_v12 = vsel %vm1901_vm5, %v1897_v10, -inf }
 0xae9   : > { %1903 = vmax.xlane.f32.xlu0 %v1902_v12 }
 0xaeb   : > { %v2060_v13 = vpop.f32.mrb[22].mxu1 }
 0xaec   : > { %v3076_v14 = vpop.f32.mrb[23].mxu1  ;;  %v2064_v15 = vsel %vm1901_vm5, %v2060_v13, -inf }
 0xaed   : > { %2065 = vmax.xlane.f32.xlu1 %v2064_v15 }
 0xaef   : > { %v2226_v19 = vpop.f32.mrb[24].mxu1 }
 0xaf0   : > { %v3086_v16 = vpop.f32.mrb[25].mxu1  ;;  %v2230_v22 = vsel %vm1901_vm5, %v2226_v19, -inf }
 0xaf1   : > { %2231 = vmax.xlane.f32.xlu0 %v2230_v22 }
 0xaf3   : > { %v2391_v17 = vpop.f32.mrb[26].mxu1 }
 0xaf4   : > { %v3096_v18 = vpop.f32.mrb[27].mxu1  ;;  %v2395_v20 = vsel %vm1901_vm5, %v2391_v17, -inf }
 0xaf5   : > { %2396 = vmax.xlane.f32.xlu0 %v2395_v20 }
 0xb76   : > { %v1904_v27 = vpop.xlane.xlu0 %1903 }
 0xb77   : > { %v1905_v29 = vsub.f32 %v1897_v10, %v1904_v27 }
 0xb79   : > { %v1906_v31 = vmul.f32 1.442695, %v1905_v29 }
 0xb7a   : > { %v2066_v32 = vpop.xlane.xlu1 %2065 }
 0xb7b   : > { %3411 = vpow2.f32 %v1906_v31  ;;  %v2067_v33 = vsub.f32 %v2060_v13, %v2066_v32 }
 0xb7d   : > { %v2068_v34 = vmul.f32 1.442695, %v2067_v33  ;;  %v3427_v33 = vld [vmem:[%s3848_s17 + $0x8] sm:$0xff] }
 0xb7e   : > { %v2232_v35 = vpop.xlane.xlu0 %2231 }
 0xb7f   : > { %3413 = vpow2.f32 %v2068_v34  ;;  %v2233_v36 = vsub.f32 %v2226_v19, %v2232_v35  ;;  %v3428_v35 = vld [vmem:[%s3848_s17] sm:$0xff] }
 0xb81   : > { %v2234_v37 = vmul.f32 1.442695, %v2233_v36 }
 0xb82   : > { %v2397_v46 = vpop.xlane.xlu0 %2396 }
 0xb83   : > { %3415 = vpow2.f32 %v2234_v37  ;;  %v2398_v47 = vsub.f32 %v2391_v17, %v2397_v46  ;;  %v4143_v46 = vld [vmem:[%s4240_s3 + $0x8] sm:$0x3] }
 0xb85   : > { %v4081_v40 = vpop.eup %3411  ;;  %v2399_v48 = vmul.f32 1.442695, %v2398_v47 }
 0xb86   : > { %v1908_v41 = vsel %vm1901_vm5, %v4081_v40, 0.0 }
 0xb87   : > { %1909 = vadd.xlane.f32.xlu0 %v1908_v41  ;;  %3417 = vpow2.f32 %v2399_v48 }
 0xb89   : > { %v4085_v23 = vpop.eup %3413 }
 0xb8a   : > { %v2070_v42 = vsel %vm1901_vm5, %v4085_v23, 0.0 }
 0xb8b   : > { %2071 = vadd.xlane.f32.xlu1 %v2070_v42 }
 0xb8d   : > { %v4089_v44 = vpop.eup %3415 }
 0xb8e   : > { %v2236_v45 = vsel %vm1901_vm5, %v4089_v44, 0.0 }
 0xb8f   : > { %2237 = vadd.xlane.f32.xlu0 %v2236_v45 }
 0xb9c   : > { %2241 = vrot.lane.b32.xlu1 %v3926_v6, %s3635_s15 }
 0xba5   : > { %2076 = vrot.lane.b32.xlu0 %v3926_v6, %s3634_s13 }
 0xba9   : > { %1797 = vrot.lane.b32.xlu0 %v3999_v60, %s3636_s16  ;;  %v3418_v60 = vpop.eup %3417 }
 0xbaa   : > { %v2401_v55 = vsel %vm1901_vm5, %v3418_v60, 0.0 }
 0xbad   : > { %1805 = vrot.lane.b32.xlu0 %v4026_v38, %s3635_s15  ;;  %v3358_v38 = vld [vmem:[#allocation7 + $0x114] ss:$40 sps:$4 sm:$0xff]  }
 0xbae   : > { %2599 = vmatprep.subr.bf16.mxu1 %v3358_v38 }
 0xbaf   : > { %2600 = vmatpush1.bf16.msra.mxu1 %v3356_v56 }
 0xbb0   : > { %2601 = vmatprep.subr.bf16.mxu1 %v3361_v57 }
 0xbb1   : > { %1813 = vrot.lane.b32.xlu0 %v3061_v8, %s3634_s13 }
 0xbb3   : > { %2602 = vmatpush1.bf16.msra.mxu1 %v3359_v58  ;;  %v3429_v58 = vld [vmem:[%s3858_s14] sm:$0xff]  ;;  %s3639_s14 = smov [#allocation8]  }
 0xbb4   : > { %2603 = vmatprep.subr.bf16.mxu1 %v3364_v43  ;;  %s3522_s28 = sshll.u32 %s3639_s14, 4  ;;  %s3523_s28 = int_to_ptr.vmem [resolvable:$false] %s3522_s28 }
 0xbb5   : > { %s3524_s10 = scalar_lea.vmem %s3523_s28, 512  ;;  %p3525_p9 = scmp.lt.s32.totalorder %s4153_s11, %s3523_s28 }
 0xbb6   : > { %p3526_p2 = scmp.lt.s32.totalorder %s3524_s10, %s3518_s24 }
 0xbb7   : > { %2604 = vmatpush1.bf16.msra.mxu1 %v3362_v59 }
 0xbb8   : > { %2605 = vmatprep.subr.bf16.mxu1 %v3367_v62  ;;  %p3527_p5 = por %p3526_p2, %p3525_p9 }
 0xbba   : > { %p3528_p1 = pnand %p3527_p5, %p3521_p7 }
 0xbbb   : > { %2606 = vmatpush1.bf16.msra.mxu1 %v3365_v63 }
 0xbc0   : > { %2402 = vadd.xlane.f32.xlu1 %v2401_v55 }
 0xbd1   : > { %2406 = vrot.lane.b32.xlu1 %v3926_v6, %s3636_s16  ;;  %v3370_v6 = vld [vmem:[#allocation7 + $0x254] ss:$40 sps:$4 sm:$0xff]  }
 0xbd2   : > { %2607 = vmatprep.subr.bf16.mxu1 %v3370_v6 }
 0xbd3   : > { %2608 = vmatpush1.bf16.msra.mxu1 %v3368_v1 }
 0xbd5   : > { %1795 = vrot.lane.b32.xlu1 %v4001_v61, %s3636_s16 }
 0xbd9   : > { %1803 = vrot.lane.b32.xlu1 %v4028_v39, %s3635_s15 }
 0xbdd   : > { %1811 = vrot.lane.b32.xlu1 %v4075_v9, %s3634_s13 }
 0xc14   : > { %v1910_v61 = vpop.xlane.xlu0 %1909 }
 0xc15   : > { %3419 = vrcp.f32 %v1910_v61 }
 0xc18   : > { %v2072_v2 = vpop.xlane.xlu1 %2071 }
 0xc19   : > { %3421 = vrcp.f32 %v2072_v2 }
 0xc1c   : > { %v2238_v3 = vpop.xlane.xlu0 %2237  ;;  %v2242_v8 = vpop.permute.xlu1 %2241 }
 0xc1d   : > { %3423 = vrcp.f32 %v2238_v3 }
 0xc1f   : > { %v3420_v4 = vpop.eup %3419 }
 0xc20   : > { %v1912_v39 = vmul.f32 %v3420_v4, %v4081_v40  ;;  %v2077_v25 = vpop.permute.xlu0 %2076 }
 0xc22   : > { %3070 = vmatmul.mubr.msk.f32.vlgmr.msra.gmra.mrb[24].mxu0 %vm1901_vm5, %v1912_v39 }
 0xc23   : > { %v3422_v7 = vpop.eup %3421  ;;  %3078 = vmatpush3.msra.mxu0 %v2077_v25  ;;  %3079 = vmatprep.mubr.msk.f32.mxu0 %vm3638_vm4, %v3637_v30 }
 0xc24   : > { %v2074_v5 = vmul.f32 %v3422_v7, %v4085_v23  ;;  %3087 = vmatprep.subr.mxu0 %v3637_v30  ;;  %v1798_v11 = vpop.permute.xlu0 %1797 }
 0xc25   : > { %v1818_v18 = vsel %vm999_vm1, %v3975_v21, %v1798_v11 }
 0xc26   : > { %3080 = vmatmul.mubr.msk.f32.vlgmr.msra.gmra.mrb[26].mxu0 %vm1901_vm5, %v2074_v5 }
 0xc27   : > { %v3424_v9 = vpop.eup %3423  ;;  %3088 = vmatpush3.msra.mxu0 %v2242_v8  ;;  %3089 = vmatprep.mubr.msk.f32.mxu0 %vm3638_vm4, %v3637_v30 }
 0xc28   : > { %v2240_v10 = vmul.f32 %v3424_v9, %v4089_v44  ;;  %3097 = vmatprep.subr.mxu0 %v3637_v30  ;;  %v1806_v14 = vpop.permute.xlu0 %1805 }
 0xc2a   : > { %3090 = vmatmul.mubr.msk.f32.vlgmr.msra.gmra.mrb[28].mxu0 %vm1901_vm5, %v2240_v10 }
 0xc2b   : > { %3099 = vmatprep.mubr.msk.f32.mxu0 %vm3638_vm4, %v3637_v30  ;;  %v1821_v30 = vsel %vm1819_vm6, %v1818_v18, %v1806_v14 }
 0xc2c   : > { %v1814_v16 = vpop.permute.xlu0 %1813 }
 0xc2d   : > { %v1824_v20 = vsel %vm1822_vm7, %v1821_v30, %v1814_v16 }
 0xc2e   : > { %v2498_v34 = vadd.f32 %v3427_v33, %v1824_v20 }
 0xc4d   : > { %v2403_v12 = vpop.xlane.xlu1 %2402 }
 0xc4e   : > { %3425 = vrcp.f32 %v2403_v12 }
 0xc51   : > { %v2407_v13 = vpop.permute.xlu1 %2406 }
 0xc52   : > { %3098 = vmatpush3.msra.mxu0 %v2407_v13 }
 0xc55   : > { %v1796_v15 = vpop.permute.xlu1 %1795 }
 0xc56   : > { %v1817_v27 = vsel %vm999_vm1, %v3977_v24, %v1796_v15 }
 0xc58   : > { %v3426_v19 = vpop.eup %3425 }
 0xc59   : > { %v2405_v22 = vmul.f32 %v3426_v19, %v3418_v60  ;;  %v1804_v17 = vpop.permute.xlu1 %1803 }
 0xc5a   : > { %v1820_v29 = vsel %vm1819_vm6, %v1817_v27, %v1804_v17 }
 0xc5b   : > { %3100 = vmatmul.mubr.msk.f32.vlgmr.msra.gmra.mrb[30].mxu0 %vm1901_vm5, %v2405_v22 }
 0xc5d   : > { %v1812_v31 = vpop.permute.xlu1 %1811 }
 0xc5e   : > { %v1823_v32 = vsel %vm1822_vm7, %v1820_v29, %v1812_v31 }
 0xc5f   : > { %v2497_v36 = vadd.f32 %v3428_v35, %v1823_v32 }
 0xc61   : > { %v2500_v37 = vpack.c.bf16 %v2498_v34, %v2497_v36 }
 0xc63   : > { %2626 = vmatmul.mubr.bf16.vlgmr.msra.gmra.mrb[28].mxu1 %v2500_v37 }
 0xc64   : > { %2633 = vmatprep.mubr.bf16.mxu1 %v3633_v0  ;;  %v2506_v0 = vrot.slane %v4143_v46, %v3900_v26 }
 0xcf5   : > { %v1982_v21 = vpop.f32.mrb[24].mxu0 }
 0xcf6   : > { %v3071_v40 = vpop.f32.mrb[25].mxu0 }
 0xcf9   : > { %v2148_v41 = vpop.f32.mrb[26].mxu0 }
 0xcfa   : > { %2483 = vrot.lane.b32.xlu1 %v2148_v41, %s3636_s16  ;;  %v3081_v23 = vpop.f32.mrb[27].mxu0 }
 0xcfd   : > { %v2313_v24 = vpop.f32.mrb[28].mxu0 }
 0xcfe   : > { %2487 = vrot.lane.b32.xlu0 %v2313_v24, %s3635_s15  ;;  %v3091_v42 = vpop.f32.mrb[29].mxu0 }
 0xd2e   : > { %v2478_v44 = vpop.f32.mrb[30].mxu0 }
 0xd2f   : > { %2491 = vrot.lane.b32.xlu1 %v2478_v44, %s3634_s13  ;;  %v3101_v45 = vpop.f32.mrb[31].mxu0 }
 0xd36   : > { %v2627_v47 = vpop.f32.mrb[28].mxu1 }
 0xd37   : > { %v2628_v48 = vadd.f32 %v2627_v47, %v2506_v0  ;;  %v2629_v49 = vpop.f32.mrb[29].mxu1 }
 0xd38   : > { %v2630_v50 = vpop.f32.mrb[30].mxu1 }
 0xd39   : > { %v2641_v51 = vmax.f32 %v2628_v48, 0.0  ;;  %v2631_v52 = vadd.f32 %v2630_v50, %v2506_v0  ;;  %v2632_v53 = vpop.f32.mrb[31].mxu1 }
 0xd3b   : > { %2644 = vst [vmem:[%s297_s29] sm:$0xff] %v2641_v51  ;;  %v2642_v54 = vmax.f32 %v2631_v52, 0.0 }
 0xd3d   : > { %2645 = vst [vmem:[%s297_s29 + $0x8] sm:$0xff] %v2642_v54 }
 0xd6c   : > { %v2484_v60 = vpop.permute.xlu1 %2483 }
 0xd6d   : > { %v2494_v26 = vsel %vm999_vm1, %v1982_v21, %v2484_v60 }
 0xd70   : > { %v2488_v55 = vpop.permute.xlu0 %2487 }
 0xd71   : > { %v2495_v38 = vsel %vm1819_vm6, %v2494_v26, %v2488_v55 }
 0xda1   : > { %v2492_v56 = vpop.permute.xlu1 %2491 }
 0xda2   : > { %v2496_v57 = vsel %vm1822_vm7, %v2495_v38, %v2492_v56 }
 0xda3   : > { %v2499_v43 = vadd.f32 %v3429_v58, %v2496_v57 }
 0xda5   : > { %v2501_v59 = vpack.c.bf16 %v2499_v43, %v2499_v43 }
 0xda7   : > { %2634 = vmatmul.mubr.bf16.gmra.mrb[32].mxu1 %v2501_v59 }
 0xda8   : > { %3531 = shalt.err (!%p3528_p1)
}
 0xda9   : > { %s3532_s7 = scalar_lea.hbm %s4159_s0, 256  ;;  %s3536_s16 = scalar_lea.hbm %s4241_s4, 512 }
 0xdaa   : > { %p3533_p6 = scmp.ne.s32.totalorder %s4159_s0, %s3532_s7  ;;  %p3537_p12 = scmp.lt.u32.totalorder %s4159_s0, %s4241_s4 }
 0xdab   : > { %p3538_p11 = scmp.lt.u32.totalorder %s3536_s16, %s3532_s7  ;;  %p3540_p10 = scmp.lt.u32.totalorder %s3532_s7, %s4159_s0 }
 0xdac   : > { %p3534_p8 = pnand %p3533_p6, %p4265_p13 }
 0xdad   : > { %p3539_p0 = por %p3538_p11, %p3537_p12 }
 0xdae   : > { %p3535_p4 = pneg %p3534_p8 }
 0xdaf   : > { %p3541_p3 = por %p3540_p10, %p3539_p0 }
 0xdb1   : > { %p3542_p7 = pnand %p3541_p3, %p3535_p4 }
 0xdb3   : > { %3545 = shalt.err (!%p3542_p7)
}
 0xdb4   : > { %s3640_s29 = smov 128   ;;  %s3641_s12 = smov 8   ;;  %v2510_v62 = vrot.slane %v4143_v46, %v3906_v28 }
 0xdb5   : > { %3150 = dma.vmem_to_hbm [thread:$0]  (%p4265_p13), %s4153_s11, 256, %s4159_s0, %s2648_s26, %s3640_s29, %s3640_s29, %s3641_s12  }
 0xdb6   : > { %s2953_s6 = sshll.u32 %s3694_s22, 7  ;;  %s304_s17 = scalar_lea.vmem [#allocation9], %s2827_s2 }
 0xdb7   : > { %s2682_s24 = sshll.u32 %s304_s17, 4  ;;  %s4193_s10 = scalar_lea.hbm %s4242_s5, %s2953_s6  ;;  %s4195_s24 = int_to_ptr.vmem [resolvable:$true] %s2682_s24 }
 0xdb8   : > { %s2653_s11 = scalar_lea.sflag [#allocation10], %s3842_s8  ;;  %s3546_s22 = scalar_lea.vmem %s4195_s24, 128 }
 0xdb9   : > { %p3547_p9 = scmp.ne.s32.totalorder %s4195_s24, %s3546_s22  ;;  %s3642_s2 = smov [#allocation9]  }
 0xdba   : > { %s3550_s0 = sshll.u32 %s3642_s2, 4  ;;  %s3551_s0 = int_to_ptr.vmem [resolvable:$false] %s3550_s0 }
 0xdbb   : > { %p3548_p2 = pnand %p3547_p9, %p4265_p13  ;;  %s3552_s26 = scalar_lea.vmem %s3551_s0, 256 }
 0xdbc   : > { %p3553_p1 = scmp.lt.s32.totalorder %s4195_s24, %s3551_s0  ;;  %p3554_p6 = scmp.lt.s32.totalorder %s3552_s26, %s3546_s22 }
 0xdbd   : > { %p3549_p5 = pneg %p3548_p2 }
 0xdbe   : > { %p3555_p8 = por %p3554_p6, %p3553_p1 }
 0xdc0   : > { %p3556_p4 = pnand %p3555_p8, %p3549_p5 }
 0xe7a   : > { %v2635_v63 = vpop.f32.mrb[32].mxu1 }
 0xe7b   : > { %v2636_v6 = vpop.f32.mrb[33].mxu1 }
 0xe7c   : > { %v2637_v1 = vadd.f32 %v2636_v6, %v2510_v62  ;;  %v2638_v61 = vpop.f32.mrb[34].mxu1 }
 0xe7d   : > { %v2639_v2 = vpop.f32.mrb[35].mxu1 }
 0xe7e   : > { %v2643_v3 = vmax.f32 %v2637_v1, 0.0 }
 0xe80   : > { %2646 = vst [vmem:[%s304_s17] sm:$0xff] %v2643_v3 }
 0xe81   : > { %3559 = shalt.err (!%p3556_p4)
}
 0xe82   : > { %s3560_s8 = scalar_lea.hbm %s4193_s10, 128  ;;  %s3564_s15 = scalar_lea.hbm %s4242_s5, 256 }
 0xe83   : > { %p3561_p12 = scmp.ne.s32.totalorder %s4193_s10, %s3560_s8  ;;  %p3565_p10 = scmp.lt.u32.totalorder %s4193_s10, %s4242_s5 }
 0xe84   : > { %p3566_p3 = scmp.lt.u32.totalorder %s3564_s15, %s3560_s8  ;;  %p3568_p9 = scmp.lt.u32.totalorder %s3560_s8, %s4193_s10 }
 0xe85   : > { %p3562_p11 = pnand %p3561_p12, %p4265_p13 }
 0xe86   : > { %p3567_p7 = por %p3566_p3, %p3565_p10 }
 0xe87   : > { %p3563_p0 = pneg %p3562_p11 }
 0xe88   : > { %p3569_p2 = por %p3568_p9, %p3567_p7 }
 0xe8a   : > { %p3570_p5 = pnand %p3569_p2, %p3563_p0 }
 0xe8c   : > { %3573 = shalt.err (!%p3570_p5)
}
 0xe8d   : > { %3151 = dma.vmem_to_hbm [thread:$0]  (%p4265_p13), %s4195_s24, 128, %s4193_s10, %s2653_s11  }
 0xe8e PF: > { %s2694_s27 = sand.u32 1, %s3612_s18   ;;  %p4266_p1 = scmp.ne.s32.totalorder %s4250_s25, 0 }
 0xe8f   : > { %p4267_p6 = scmp.ge.s32.totalorder %s3624_s21, 2  ;;  %s2695_s29 = scalar_lea.sflag [#allocation4], %s2694_s27 }
 0xe91   : > { %p3166_p8 = pnand %p4267_p6, %p4266_p1 }
 0xe93   : > { %3603 = dma.done.wait (!%p3166_p8), %s2695_s29, 256  }
 0xe94   : > { %3605 = vsyncadd (!%p3166_p8), %s2695_s29, 4294967040  ;;  %s2704_s12 = scalar_lea.sflag [#allocation10], %s2694_s27 }
 0xe95   : > { %3607 = dma.done.wait (!%p3166_p8), %s2704_s12, 128  }
 0xe96   : > { %3609 = vsyncadd (!%p3166_p8), %s2704_s12, 4294967168  ;;  %s4268_s9 = sld [smem:[#allocation16_spill]]  ;;  %p25_p13 = scmp.ge.s32.totalorder %s3729_s30, 4  }
 0xe97   : > { %s4269_s18 = smov %s3616_s19  ;;  %s4270_s19 = smov %s3620_s20 }
 0xe98   : > { %s4272_s21 = smov %s3729_s30  ;;  %27 = sbr.rel (!%p25_p13) target bundleno = 12 (0xc), region = 115 }
 0xe9c   : > { %s4271_s20 = smov %s4268_s9 }
 0xe9f   :  { %2709 = vsyncpa [#allocation3], 1 }
 0xea0   :  { %2711 = vsyncpa [#allocation3 + $0x1], 1 }
 0xea1   :  { %2712 = vsyncpa [#allocation6], 1 }
 0xea2   :  { %2714 = vsyncpa [#allocation6 + $0x1], 1 }
 0xea3   :  { %2715 = vsyncpa [#allocation4], 1 }
 0xea4   :  { %2717 = vsyncpa [#allocation4 + $0x1], 1 }
 0xea5   :  { %2718 = vsyncpa [#allocation10], 1 }
 0xea6   :  { %2720 = vsyncpa [#allocation10 + $0x1], 1 }

</bundles_post_ra>
